<compile_context>
chip_gen: v7x
topology: tpu7x:2x2x1
jax: 0.10.0
libtpu: 0.0.40
codegen_flags: <defaults>
</compile_context>

<pallas_src>
import math

import jax
import jax.numpy as jnp
from jax.experimental import pallas as pl
from jax.experimental.pallas import tpu as pltpu

F32 = jnp.float32
BF16 = jnp.bfloat16


def _sigmoid(x):
    return 1.0 / (1.0 + jnp.exp(-x))


def _softplus(x):
    # matches torch.nn.functional.softplus(threshold=20)
    return jnp.where(x > 20.0, x, jnp.log(1.0 + jnp.exp(jnp.minimum(x, 20.0))))


def simple_mamba_kernel(
    x_ref,                                   # (Bt, L, d_input)
    w1t_ref, b1_ref,                         # fc1: (d_input, d_model) bf16, (1, d_model)
    winx_ref, winz_ref,                      # in_proj halves: (d_model, d_inner) bf16
    wconv_ref, bconv_ref,                    # conv: (d_conv, d_inner), (1, d_inner)
    wxdt_ref, wxb_ref, wxc_ref,              # x_proj splits (d_inner, dt_rank/d_state/d_state)
    wdtt_ref, bdt_ref,                       # dt_proj: (dt_rank, d_inner), (1, d_inner)
    alogt_ref, dskip_ref,                    # A_log^T: (d_state, d_inner), D: (1, d_inner)
    woutt_ref,                               # out_proj: (d_inner, d_model) bf16
    w2t_ref, b2_ref,                         # fc2: (d_model, d_output) bf16, (1, d_output)
    out_ref,                                 # (Bt, L, d_output)
    xpad_sc, dlt_sc, du_sc, b_sc, hh_sc,     # VMEM scratch
):
    Bt, L, d_input = x_ref.shape
    d_inner = dskip_ref.shape[1]
    d_state = alogt_ref.shape[0]
    d_conv = wconv_ref.shape[0]
    d_output = out_ref.shape[2]
    BL = Bt * L

    # ---------- dense front-end: all Bt*L tokens hit the MXU together ----------
    x = x_ref[...].reshape(BL, d_input)
    h1 = jnp.dot(x.astype(BF16), w1t_ref[...],
                 preferred_element_type=F32) + b1_ref[...]                  # (BL, d_model)
    h1b = h1.astype(BF16)
    xin = jnp.dot(h1b, winx_ref[...], preferred_element_type=F32)           # (BL, d_inner)
    z = jnp.dot(h1b, winz_ref[...], preferred_element_type=F32)             # (BL, d_inner)

    # ---------- causal depthwise conv over time (zero-padded scratch) ----------
    xpad_sc[...] = jnp.zeros_like(xpad_sc)
    xpad_sc[:, pl.ds(d_conv - 1, L), :] = xin.reshape(Bt, L, d_inner)
    conv = jnp.zeros((Bt, L, d_inner), F32) + bconv_ref[...]
    for k in range(d_conv):                                                 # static unroll
        conv = conv + xpad_sc[:, pl.ds(k, L), :] * wconv_ref[pl.ds(k, 1), :]
    u3 = conv * _sigmoid(conv)                                              # SiLU (Bt, L, d_inner)
    u = u3.reshape(BL, d_inner)

    # ---------- x_proj / dt_proj (kept f32: feeds the sensitive delta path) ----
    dt_r = jnp.dot(u, wxdt_ref[...], preferred_element_type=F32)            # (BL, dt_rank)
    bmat = jnp.dot(u, wxb_ref[...], preferred_element_type=F32)             # (BL, d_state)
    cmat = jnp.dot(u, wxc_ref[...], preferred_element_type=F32)             # (BL, d_state)
    draw = jnp.dot(dt_r, wdtt_ref[...], preferred_element_type=F32) + bdt_ref[...]
    delta = _softplus(draw)                                                 # (BL, d_inner)

    a_t = -jnp.exp(alogt_ref[...])                                          # (d_state, d_inner)
    a_b = a_t[None, :, :]                                                   # hoisted broadcast

    # stage per-step scan inputs (tiny 2-D slabs; the big dA/dBu are never stored)
    dlt_sc[...] = delta.reshape(Bt, L, d_inner)
    du_sc[...] = (delta * u).reshape(Bt, L, d_inner)
    b_sc[...] = bmat.reshape(Bt, L, d_state)[:, :, :, None]                 # (Bt, L, d_state, 1)

    # ---------- selective scan: h carried in registers, on-the-fly dA/dBu ------
    def step(t, h):
        d_t = dlt_sc[:, pl.ds(t, 1), :]                                     # (Bt, 1, d_inner)
        du_t = du_sc[:, pl.ds(t, 1), :]                                     # (Bt, 1, d_inner)
        b_t = b_sc[:, pl.ds(t, 1), :, :].reshape(Bt, d_state, 1)            # (Bt, d_state, 1)
        dA = jnp.exp(d_t * a_b)                                             # (Bt, d_state, d_inner)
        h = dA * h + b_t * du_t                                             # (Bt, d_state, d_inner)
        hh_sc[:, pl.ds(t, 1), :, :] = h[:, None, :, :]
        return h

    h = jnp.zeros((Bt, d_state, d_inner), F32)
    if L <= 16:
        # short static trip count: full unroll for LLO scheduling visibility
        for t in range(L):
            h = step(t, h)
    else:
        h = jax.lax.fori_loop(0, L, step, h, unroll=8)
        # TODO(synk): for very long L, chunk the time axis so hh_sc stays small in VMEM.

    # y[b,t,d] = sum_s C[b,t,s] * h_hist[b,t,s,d]  (VPU mul + sublane reduce, no MXU)
    cc = cmat.reshape(Bt, L, d_state)[:, :, :, None]                        # (Bt, L, d_state, 1)
    y3 = jnp.sum(cc * hh_sc[...], axis=2)                                   # (Bt, L, d_inner)

    # ---------- skip (D), SiLU(z) gate, out_proj, DropPath(identity), fc2 ------
    y = y3.reshape(BL, d_inner) + u * dskip_ref[...]
    y = y * (z * _sigmoid(z))
    ym = jnp.dot(y.astype(BF16), woutt_ref[...], preferred_element_type=F32)  # (BL, d_model)
    # TODO(synk): DropPath (stochastic depth) is identity in eval mode; training-time
    # random path dropping is not implemented.
    out = jnp.dot(ym.astype(BF16), w2t_ref[...], preferred_element_type=F32) + b2_ref[...]
    out_ref[...] = out.reshape(Bt, L, d_output).astype(out_ref.dtype)


def simple_mamba_forward(x, params):
    B, L, d_input = x.shape
    d_model = params["W1"].shape[0]
    d_inner, d_state = params["A_log"].shape
    d_conv = params["conv_w"].shape[1]
    dt_rank = params["W_dt"].shape[1]
    d_output = params["W2"].shape[0]

    # Weight prep (plain-JAX glue): transposes / splits; bf16 for the big dense
    # layers (native MXU rate), f32 for everything feeding the recurrence.
    w1t = params["W1"].T.astype(BF16)
    b1 = params["b1"].reshape(1, d_model).astype(F32)
    winx = params["W_in"][:d_inner].T.astype(BF16)
    winz = params["W_in"][d_inner:].T.astype(BF16)
    wconv = params["conv_w"].T.astype(F32)                    # (d_conv, d_inner)
    bconv = params["conv_b"].reshape(1, d_inner).astype(F32)
    wxdt = params["W_xp"][:dt_rank].T.astype(F32)
    wxb = params["W_xp"][dt_rank:dt_rank + d_state].T.astype(F32)
    wxc = params["W_xp"][dt_rank + d_state:].T.astype(F32)
    wdtt = params["W_dt"].T.astype(F32)
    bdt = params["b_dt"].reshape(1, d_inner).astype(F32)
    alogt = params["A_log"].T.astype(F32)                     # (d_state, d_inner)
    dskip = params["D"].reshape(1, d_inner).astype(F32)
    woutt = params["W_out"].T.astype(BF16)
    w2t = params["W2"].T.astype(BF16)
    b2 = params["b2"].reshape(1, d_output).astype(F32)

    weights = [w1t, b1, winx, winz, wconv, bconv, wxdt, wxb, wxc,
               wdtt, bdt, alogt, dskip, woutt, w2t, b2]

    # batch tile per grid step (whole batch when small); batch axis is independent.
    if B <= 8:
        Bt = B
    elif B % 8 == 0:
        Bt = 8
    else:
        Bt = B
    grid = (B // Bt,)

    def full_spec(a):
        nd = a.ndim
        return pl.BlockSpec(a.shape, lambda b: (0,) * nd)

    grid_spec = pltpu.PrefetchScalarGridSpec(
        num_scalar_prefetch=0,
        grid=grid,
        in_specs=[pl.BlockSpec((Bt, L, d_input), lambda b: (b, 0, 0))]
                 + [full_spec(w) for w in weights],
        out_specs=pl.BlockSpec((Bt, L, d_output), lambda b: (b, 0, 0)),
        scratch_shapes=[
            pltpu.VMEM((Bt, L + d_conv - 1, d_inner), F32),   # zero-padded conv input
            pltpu.VMEM((Bt, L, d_inner), F32),                # delta
            pltpu.VMEM((Bt, L, d_inner), F32),                # delta * u
            pltpu.VMEM((Bt, L, d_state, 1), F32),             # B (pre-broadcast layout)
            pltpu.VMEM((Bt, L, d_state, d_inner), F32),       # h history
        ],
    )
    return pl.pallas_call(
        simple_mamba_kernel,
        out_shape=jax.ShapeDtypeStruct((B, L, d_output), F32),
        grid_spec=grid_spec,
        compiler_params=pltpu.CompilerParams(
            dimension_semantics=("parallel",)),
    )(x.astype(F32), *weights)


def ref_forward(x, p):
    """Pure-JAX reference mirroring mamba_simple / selective_scan semantics."""
    d_inner, d_state = p["A_log"].shape
    d_conv = p["conv_w"].shape[1]
    dt_rank = p["W_dt"].shape[1]
    B, L, _ = x.shape

    h1 = jnp.einsum("bli,oi->blo", x, p["W1"]) + p["b1"]
    xz = jnp.einsum("blm,dm->bld", h1, p["W_in"])
    xi, z = xz[..., :d_inner], xz[..., d_inner:]

    xpad = jnp.pad(xi, ((0, 0), (d_conv - 1, 0), (0, 0)))
    conv = jnp.zeros_like(xi) + p["conv_b"][None, None, :]
    for k in range(d_conv):
        conv = conv + xpad[:, k:k + L, :] * p["conv_w"][None, None, :, k]
    u = conv * _sigmoid(conv)

    x_dbl = jnp.einsum("bld,rd->blr", u, p["W_xp"])
    dt_r = x_dbl[..., :dt_rank]
    bm = x_dbl[..., dt_rank:dt_rank + d_state]
    cm = x_dbl[..., dt_rank + d_state:]
    draw = jnp.einsum("blr,dr->bld", dt_r, p["W_dt"]) + p["b_dt"]
    delta = _softplus(draw)
    A = -jnp.exp(p["A_log"])

    def step(h, inp):
        d_t, u_t, b_t, c_t = inp
        dA = jnp.exp(d_t[..., None] * A[None])
        h = dA * h + (d_t * u_t)[..., None] * b_t[:, None, :]
        y = jnp.einsum("bdn,bn->bd", h, c_t)
        return h, y

    h0 = jnp.zeros((B, d_inner, d_state), jnp.float32)
    _, ys = jax.lax.scan(
        step, h0,
        (delta.transpose(1, 0, 2), u.transpose(1, 0, 2),
         bm.transpose(1, 0, 2), cm.transpose(1, 0, 2)))
    y = ys.transpose(1, 0, 2) + u * p["D"][None, None, :]
    y = y * (z * _sigmoid(z))
    ym = jnp.einsum("bld,md->blm", y, p["W_out"])
    out = jnp.einsum("blm,om->blo", ym, p["W2"]) + p["b2"]
    return out


if __name__ == "__main__":
    # SimpleMAMBA(d_model=32, d_state=16, d_conv=4, d_input=16, d_output=16, drop_path=0.0)
    d_input, d_model, d_state, d_conv, d_output = 16, 32, 16, 4, 16
    expand = 2
    d_inner = expand * d_model
    dt_rank = math.ceil(d_model / 16)
    B, L = 2, 8

    key = jax.random.PRNGKey(0)
    ks = jax.random.split(key, 16)
    s = 0.1
    params = {
        "W1": jax.random.normal(ks[0], (d_model, d_input), jnp.float32) * s,
        "b1": jax.random.normal(ks[1], (d_model,), jnp.float32) * s,
        "W_in": jax.random.normal(ks[2], (2 * d_inner, d_model), jnp.float32) * s,
        "conv_w": jax.random.normal(ks[3], (d_inner, d_conv), jnp.float32) * s,
        "conv_b": jax.random.normal(ks[4], (d_inner,), jnp.float32) * s,
        "W_xp": jax.random.normal(ks[5], (dt_rank + 2 * d_state, d_inner), jnp.float32) * s,
        "W_dt": jax.random.normal(ks[6], (d_inner, dt_rank), jnp.float32) * s,
        "b_dt": jax.random.normal(ks[7], (d_inner,), jnp.float32) * 0.5 - 2.0,
        "A_log": jnp.log(jnp.broadcast_to(
            jnp.arange(1, d_state + 1, dtype=jnp.float32), (d_inner, d_state))),
        "D": jnp.ones((d_inner,), jnp.float32),
        "W_out": jax.random.normal(ks[8], (d_model, d_inner), jnp.float32) * s,
        "W2": jax.random.normal(ks[9], (d_output, d_model), jnp.float32) * s,
        "b2": jax.random.normal(ks[10], (d_output,), jnp.float32) * s,
    }
    x = jax.random.normal(ks[11], (B, L, d_input), jnp.float32)

    out = simple_mamba_forward(x, params)
    out = jax.block_until_ready(out)

    ref = ref_forward(x, params)
    err = float(jnp.max(jnp.abs(out - ref)))
    assert out.shape == (B, L, d_output)
    assert bool(jnp.isfinite(out).all())
    assert err < 5e-2, f"max abs error {err}"
    print("KERNEL_OK")
</pallas_src>

<mosaic_0001>
module attributes {stable_mosaic.version = 11 : i64} {
  func.func @simple_mamba_kernel(%arg0: i32, %arg1: memref<2x8x16xf32, #tpu.memory_space<vmem>>, %arg2: memref<16x32xbf16, #tpu.memory_space<vmem>>, %arg3: memref<1x32xf32, #tpu.memory_space<vmem>>, %arg4: memref<32x64xbf16, #tpu.memory_space<vmem>>, %arg5: memref<32x64xbf16, #tpu.memory_space<vmem>>, %arg6: memref<4x64xf32, #tpu.memory_space<vmem>>, %arg7: memref<1x64xf32, #tpu.memory_space<vmem>>, %arg8: memref<64x2xf32, #tpu.memory_space<vmem>>, %arg9: memref<64x16xf32, #tpu.memory_space<vmem>>, %arg10: memref<64x16xf32, #tpu.memory_space<vmem>>, %arg11: memref<2x64xf32, #tpu.memory_space<vmem>>, %arg12: memref<1x64xf32, #tpu.memory_space<vmem>>, %arg13: memref<16x64xf32, #tpu.memory_space<vmem>>, %arg14: memref<1x64xf32, #tpu.memory_space<vmem>>, %arg15: memref<64x32xbf16, #tpu.memory_space<vmem>>, %arg16: memref<32x16xbf16, #tpu.memory_space<vmem>>, %arg17: memref<1x16xf32, #tpu.memory_space<vmem>>, %arg18: memref<2x8x16xf32, #tpu.memory_space<vmem>>, %arg19: memref<2x11x64xf32, #tpu.memory_space<vmem>>, %arg20: memref<2x8x64xf32, #tpu.memory_space<vmem>>, %arg21: memref<2x8x64xf32, #tpu.memory_space<vmem>>, %arg22: memref<2x8x16x1xf32, #tpu.memory_space<vmem>>, %arg23: memref<2x8x16x64xf32, #tpu.memory_space<vmem>>) attributes {dimension_semantics = [#tpu.dimension_semantics<parallel>], iteration_bounds = array<i64: 1>, scalar_prefetch = 0 : i64, scratch_operands = 5 : i64, tpu.core_type = #tpu.core_type<tc>, window_params = [{transform_indices = @transform_0, window_bounds = array<i64: 2, 8, 16>}, {pipeline_mode = #tpu.pipeline_mode<synchronous>, transform_indices = @transform_1, window_bounds = array<i64: 16, 32>}, {pipeline_mode = #tpu.pipeline_mode<synchronous>, transform_indices = @transform_2, window_bounds = array<i64: 1, 32>}, {pipeline_mode = #tpu.pipeline_mode<synchronous>, transform_indices = @transform_3, window_bounds = array<i64: 32, 64>}, {pipeline_mode = #tpu.pipeline_mode<synchronous>, transform_indices = @transform_4, window_bounds = array<i64: 32, 64>}, {pipeline_mode = #tpu.pipeline_mode<synchronous>, transform_indices = @transform_5, window_bounds = array<i64: 4, 64>}, {pipeline_mode = #tpu.pipeline_mode<synchronous>, transform_indices = @transform_6, window_bounds = array<i64: 1, 64>}, {pipeline_mode = #tpu.pipeline_mode<synchronous>, transform_indices = @transform_7, window_bounds = array<i64: 64, 2>}, {pipeline_mode = #tpu.pipeline_mode<synchronous>, transform_indices = @transform_8, window_bounds = array<i64: 64, 16>}, {pipeline_mode = #tpu.pipeline_mode<synchronous>, transform_indices = @transform_9, window_bounds = array<i64: 64, 16>}, {pipeline_mode = #tpu.pipeline_mode<synchronous>, transform_indices = @transform_10, window_bounds = array<i64: 2, 64>}, {pipeline_mode = #tpu.pipeline_mode<synchronous>, transform_indices = @transform_11, window_bounds = array<i64: 1, 64>}, {pipeline_mode = #tpu.pipeline_mode<synchronous>, transform_indices = @transform_12, window_bounds = array<i64: 16, 64>}, {pipeline_mode = #tpu.pipeline_mode<synchronous>, transform_indices = @transform_13, window_bounds = array<i64: 1, 64>}, {pipeline_mode = #tpu.pipeline_mode<synchronous>, transform_indices = @transform_14, window_bounds = array<i64: 64, 32>}, {pipeline_mode = #tpu.pipeline_mode<synchronous>, transform_indices = @transform_15, window_bounds = array<i64: 32, 16>}, {pipeline_mode = #tpu.pipeline_mode<synchronous>, transform_indices = @transform_16, window_bounds = array<i64: 1, 16>}, {transform_indices = @transform_17, window_bounds = array<i64: 2, 8, 16>}]} {
    %c0 = arith.constant 0 : index
    %c0_0 = arith.constant 0 : index
    %c0_1 = arith.constant 0 : index
    %0 = vector.load %arg1[%c0, %c0_0, %c0_1] : memref<2x8x16xf32, #tpu.memory_space<vmem>>, vector<2x8x16xf32>
    %1 = vector.shape_cast %0 : vector<2x8x16xf32> to vector<16x16xf32>
    %2 = arith.truncf %1 : vector<16x16xf32> to vector<16x16xbf16>
    %c0_2 = arith.constant 0 : index
    %c0_3 = arith.constant 0 : index
    %3 = vector.load %arg2[%c0_2, %c0_3] : memref<16x32xbf16, #tpu.memory_space<vmem>>, vector<16x32xbf16>
    %cst = arith.constant dense<0.000000e+00> : vector<16x32xf32>
    %4 = tpu.matmul %2, %3, %cst {dimension_numbers = #tpu.dot_dimension_numbers<[1], [0], [0], [1], [0, 0, 1, 1], [], []>} : vector<16x16xbf16>, vector<16x32xbf16>, vector<16x32xf32> -> vector<16x32xf32>
    %c0_4 = arith.constant 0 : index
    %c0_5 = arith.constant 0 : index
    %5 = vector.load %arg3[%c0_4, %c0_5] : memref<1x32xf32, #tpu.memory_space<vmem>>, vector<1x32xf32>
    %6 = vector.broadcast %5 : vector<1x32xf32> to vector<16x32xf32>
    %7 = arith.addf %4, %6 : vector<16x32xf32>
    %8 = arith.truncf %7 : vector<16x32xf32> to vector<16x32xbf16>
    %c0_6 = arith.constant 0 : index
    %c0_7 = arith.constant 0 : index
    %9 = vector.load %arg4[%c0_6, %c0_7] : memref<32x64xbf16, #tpu.memory_space<vmem>>, vector<32x64xbf16>
    %cst_8 = arith.constant dense<0.000000e+00> : vector<16x64xf32>
    %10 = tpu.matmul %8, %9, %cst_8 {dimension_numbers = #tpu.dot_dimension_numbers<[1], [0], [0], [1], [0, 0, 1, 1], [], []>} : vector<16x32xbf16>, vector<32x64xbf16>, vector<16x64xf32> -> vector<16x64xf32>
    %c0_9 = arith.constant 0 : index
    %c0_10 = arith.constant 0 : index
    %11 = vector.load %arg5[%c0_9, %c0_10] : memref<32x64xbf16, #tpu.memory_space<vmem>>, vector<32x64xbf16>
    %cst_11 = arith.constant dense<0.000000e+00> : vector<16x64xf32>
    %12 = tpu.matmul %8, %11, %cst_11 {dimension_numbers = #tpu.dot_dimension_numbers<[1], [0], [0], [1], [0, 0, 1, 1], [], []>} : vector<16x32xbf16>, vector<32x64xbf16>, vector<16x64xf32> -> vector<16x64xf32>
    %cst_12 = arith.constant 0.000000e+00 : f32
    %13 = vector.broadcast %cst_12 : f32 to vector<2x11x64xf32>
    %c0_13 = arith.constant 0 : index
    %c0_14 = arith.constant 0 : index
    %c0_15 = arith.constant 0 : index
    %14 = vector.load %arg19[%c0_13, %c0_14, %c0_15] : memref<2x11x64xf32, #tpu.memory_space<vmem>>, vector<2x11x64xf32>
    tpu.vector_store %arg19[%c0_13, %c0_14, %c0_15], %13 {strides = array<i32>} : memref<2x11x64xf32, #tpu.memory_space<vmem>>, vector<2x11x64xf32>,
    %15 = vector.shape_cast %10 : vector<16x64xf32> to vector<2x8x64xf32>
    %c0_16 = arith.constant 0 : index
    %c3 = arith.constant 3 : index
    %c0_17 = arith.constant 0 : index
    %16 = vector.load %arg19[%c0_16, %c3, %c0_17] : memref<2x11x64xf32, #tpu.memory_space<vmem>>, vector<2x8x64xf32>
    tpu.vector_store %arg19[%c0_16, %c3, %c0_17], %15 {strides = array<i32>} : memref<2x11x64xf32, #tpu.memory_space<vmem>>, vector<2x8x64xf32>,
    %cst_18 = arith.constant 0.000000e+00 : f32
    %17 = vector.broadcast %cst_18 : f32 to vector<2x8x64xf32>
    %c0_19 = arith.constant 0 : index
    %c0_20 = arith.constant 0 : index
    %18 = vector.load %arg7[%c0_19, %c0_20] : memref<1x64xf32, #tpu.memory_space<vmem>>, vector<1x64xf32>
    %19 = vector.shape_cast %18 : vector<1x64xf32> to vector<1x1x64xf32>
    %20 = vector.broadcast %19 : vector<1x1x64xf32> to vector<2x8x64xf32>
    %21 = arith.addf %17, %20 : vector<2x8x64xf32>
    %c0_21 = arith.constant 0 : index
    %c0_22 = arith.constant 0 : index
    %c0_23 = arith.constant 0 : index
    %22 = vector.load %arg19[%c0_21, %c0_22, %c0_23] : memref<2x11x64xf32, #tpu.memory_space<vmem>>, vector<2x8x64xf32>
    %c0_24 = arith.constant 0 : index
    %c0_25 = arith.constant 0 : index
    %23 = vector.load %arg6[%c0_24, %c0_25] : memref<4x64xf32, #tpu.memory_space<vmem>>, vector<1x64xf32>
    %24 = vector.shape_cast %23 : vector<1x64xf32> to vector<1x1x64xf32>
    %25 = vector.broadcast %24 : vector<1x1x64xf32> to vector<2x8x64xf32>
    %26 = arith.mulf %22, %25 : vector<2x8x64xf32>
    %27 = arith.addf %21, %26 : vector<2x8x64xf32>
    %c0_26 = arith.constant 0 : index
    %c1 = arith.constant 1 : index
    %c0_27 = arith.constant 0 : index
    %28 = vector.load %arg19[%c0_26, %c1, %c0_27] : memref<2x11x64xf32, #tpu.memory_space<vmem>>, vector<2x8x64xf32>
    %c1_28 = arith.constant 1 : index
    %c0_29 = arith.constant 0 : index
    %29 = vector.load %arg6[%c1_28, %c0_29] : memref<4x64xf32, #tpu.memory_space<vmem>>, vector<1x64xf32>
    %30 = vector.shape_cast %29 : vector<1x64xf32> to vector<1x1x64xf32>
    %31 = vector.broadcast %30 : vector<1x1x64xf32> to vector<2x8x64xf32>
    %32 = arith.mulf %28, %31 : vector<2x8x64xf32>
    %33 = arith.addf %27, %32 : vector<2x8x64xf32>
    %c0_30 = arith.constant 0 : index
    %c2 = arith.constant 2 : index
    %c0_31 = arith.constant 0 : index
    %34 = vector.load %arg19[%c0_30, %c2, %c0_31] : memref<2x11x64xf32, #tpu.memory_space<vmem>>, vector<2x8x64xf32>
    %c2_32 = arith.constant 2 : index
    %c0_33 = arith.constant 0 : index
    %35 = vector.load %arg6[%c2_32, %c0_33] : memref<4x64xf32, #tpu.memory_space<vmem>>, vector<1x64xf32>
    %36 = vector.shape_cast %35 : vector<1x64xf32> to vector<1x1x64xf32>
    %37 = vector.broadcast %36 : vector<1x1x64xf32> to vector<2x8x64xf32>
    %38 = arith.mulf %34, %37 : vector<2x8x64xf32>
    %39 = arith.addf %33, %38 : vector<2x8x64xf32>
    %c0_34 = arith.constant 0 : index
    %c3_35 = arith.constant 3 : index
    %c0_36 = arith.constant 0 : index
    %40 = vector.load %arg19[%c0_34, %c3_35, %c0_36] : memref<2x11x64xf32, #tpu.memory_space<vmem>>, vector<2x8x64xf32>
    %c3_37 = arith.constant 3 : index
    %c0_38 = arith.constant 0 : index
    %41 = vector.load %arg6[%c3_37, %c0_38] : memref<4x64xf32, #tpu.memory_space<vmem>>, vector<1x64xf32>
    %42 = vector.shape_cast %41 : vector<1x64xf32> to vector<1x1x64xf32>
    %43 = vector.broadcast %42 : vector<1x1x64xf32> to vector<2x8x64xf32>
    %44 = arith.mulf %40, %43 : vector<2x8x64xf32>
    %45 = arith.addf %39, %44 : vector<2x8x64xf32>
    %cst_39 = arith.constant 0.000000e+00 : f32
    %46 = vector.broadcast %cst_39 : f32 to vector<2x8x64xf32>
    %47 = arith.subf %46, %45 : vector<2x8x64xf32>
    %48 = math.exp %47 : vector<2x8x64xf32>
    %cst_40 = arith.constant 1.000000e+00 : f32
    %49 = vector.broadcast %cst_40 : f32 to vector<2x8x64xf32>
    %50 = arith.addf %49, %48 : vector<2x8x64xf32>
    %cst_41 = arith.constant 1.000000e+00 : f32
    %51 = vector.broadcast %cst_41 : f32 to vector<2x8x64xf32>
    %52 = arith.divf %51, %50 : vector<2x8x64xf32>
    %53 = arith.mulf %45, %52 : vector<2x8x64xf32>
    %54 = vector.shape_cast %53 : vector<2x8x64xf32> to vector<16x64xf32>
    %c0_42 = arith.constant 0 : index
    %c0_43 = arith.constant 0 : index
    %55 = vector.load %arg8[%c0_42, %c0_43] : memref<64x2xf32, #tpu.memory_space<vmem>>, vector<64x2xf32>
    %cst_44 = arith.constant dense<0.000000e+00> : vector<16x2xf32>
    %56 = tpu.matmul %54, %55, %cst_44 {dimension_numbers = #tpu.dot_dimension_numbers<[1], [0], [0], [1], [0, 0, 1, 1], [], []>} : vector<16x64xf32>, vector<64x2xf32>, vector<16x2xf32> -> vector<16x2xf32>
    %c0_45 = arith.constant 0 : index
    %c0_46 = arith.constant 0 : index
    %57 = vector.load %arg9[%c0_45, %c0_46] : memref<64x16xf32, #tpu.memory_space<vmem>>, vector<64x16xf32>
    %cst_47 = arith.constant dense<0.000000e+00> : vector<16x16xf32>
    %58 = tpu.matmul %54, %57, %cst_47 {dimension_numbers = #tpu.dot_dimension_numbers<[1], [0], [0], [1], [0, 0, 1, 1], [], []>} : vector<16x64xf32>, vector<64x16xf32>, vector<16x16xf32> -> vector<16x16xf32>
    %c0_48 = arith.constant 0 : index
    %c0_49 = arith.constant 0 : index
    %59 = vector.load %arg10[%c0_48, %c0_49] : memref<64x16xf32, #tpu.memory_space<vmem>>, vector<64x16xf32>
    %cst_50 = arith.constant dense<0.000000e+00> : vector<16x16xf32>
    %60 = tpu.matmul %54, %59, %cst_50 {dimension_numbers = #tpu.dot_dimension_numbers<[1], [0], [0], [1], [0, 0, 1, 1], [], []>} : vector<16x64xf32>, vector<64x16xf32>, vector<16x16xf32> -> vector<16x16xf32>
    %c0_51 = arith.constant 0 : index
    %c0_52 = arith.constant 0 : index
    %61 = vector.load %arg11[%c0_51, %c0_52] : memref<2x64xf32, #tpu.memory_space<vmem>>, vector<2x64xf32>
    %cst_53 = arith.constant dense<0.000000e+00> : vector<16x64xf32>
    %62 = tpu.matmul %56, %61, %cst_53 {dimension_numbers = #tpu.dot_dimension_numbers<[1], [0], [0], [1], [0, 0, 1, 1], [], []>} : vector<16x2xf32>, vector<2x64xf32>, vector<16x64xf32> -> vector<16x64xf32>
    %c0_54 = arith.constant 0 : index
    %c0_55 = arith.constant 0 : index
    %63 = vector.load %arg12[%c0_54, %c0_55] : memref<1x64xf32, #tpu.memory_space<vmem>>, vector<1x64xf32>
    %64 = vector.broadcast %63 : vector<1x64xf32> to vector<16x64xf32>
    %65 = arith.addf %62, %64 : vector<16x64xf32>
    %cst_56 = arith.constant 2.000000e+01 : f32
    %66 = vector.broadcast %cst_56 : f32 to vector<16x64xf32>
    %67 = arith.cmpf ogt, %65, %66 : vector<16x64xf32>
    %cst_57 = arith.constant 2.000000e+01 : f32
    %68 = vector.broadcast %cst_57 : f32 to vector<16x64xf32>
    %69 = arith.minimumf %65, %68 : vector<16x64xf32>
    %70 = math.exp %69 : vector<16x64xf32>
    %cst_58 = arith.constant 1.000000e+00 : f32
    %71 = vector.broadcast %cst_58 : f32 to vector<16x64xf32>
    %72 = arith.addf %71, %70 : vector<16x64xf32>
    %73 = math.log %72 : vector<16x64xf32>
    %74 = arith.select %67, %65, %73 : vector<16x64xi1>, vector<16x64xf32>
    %c0_59 = arith.constant 0 : index
    %c0_60 = arith.constant 0 : index
    %75 = vector.load %arg13[%c0_59, %c0_60] : memref<16x64xf32, #tpu.memory_space<vmem>>, vector<16x64xf32>
    %76 = math.exp %75 : vector<16x64xf32>
    %cst_61 = arith.constant 0.000000e+00 : f32
    %77 = vector.broadcast %cst_61 : f32 to vector<16x64xf32>
    %78 = arith.subf %77, %76 : vector<16x64xf32>
    %79 = vector.shape_cast %78 : vector<16x64xf32> to vector<1x16x64xf32>
    %80 = vector.shape_cast %74 : vector<16x64xf32> to vector<2x8x64xf32>
    %c0_62 = arith.constant 0 : index
    %c0_63 = arith.constant 0 : index
    %c0_64 = arith.constant 0 : index
    %81 = vector.load %arg20[%c0_62, %c0_63, %c0_64] : memref<2x8x64xf32, #tpu.memory_space<vmem>>, vector<2x8x64xf32>
    tpu.vector_store %arg20[%c0_62, %c0_63, %c0_64], %80 {strides = array<i32>} : memref<2x8x64xf32, #tpu.memory_space<vmem>>, vector<2x8x64xf32>,
    %82 = arith.mulf %74, %54 : vector<16x64xf32>
    %83 = vector.shape_cast %82 : vector<16x64xf32> to vector<2x8x64xf32>
    %c0_65 = arith.constant 0 : index
    %c0_66 = arith.constant 0 : index
    %c0_67 = arith.constant 0 : index
    %84 = vector.load %arg21[%c0_65, %c0_66, %c0_67] : memref<2x8x64xf32, #tpu.memory_space<vmem>>, vector<2x8x64xf32>
    tpu.vector_store %arg21[%c0_65, %c0_66, %c0_67], %83 {strides = array<i32>} : memref<2x8x64xf32, #tpu.memory_space<vmem>>, vector<2x8x64xf32>,
    %85 = vector.shape_cast %58 : vector<16x16xf32> to vector<2x8x16xf32>
    %86 = vector.shape_cast %85 : vector<2x8x16xf32> to vector<2x8x16x1xf32>
    %c0_68 = arith.constant 0 : index
    %c0_69 = arith.constant 0 : index
    %c0_70 = arith.constant 0 : index
    %c0_71 = arith.constant 0 : index
    %87 = vector.load %arg22[%c0_68, %c0_69, %c0_70, %c0_71] : memref<2x8x16x1xf32, #tpu.memory_space<vmem>>, vector<2x8x16x1xf32>
    tpu.vector_store %arg22[%c0_68, %c0_69, %c0_70, %c0_71], %86 {strides = array<i32>} : memref<2x8x16x1xf32, #tpu.memory_space<vmem>>, vector<2x8x16x1xf32>,
    %cst_72 = arith.constant 0.000000e+00 : f32
    %88 = vector.broadcast %cst_72 : f32 to vector<2x16x64xf32>
    %c0_73 = arith.constant 0 : index
    %c0_74 = arith.constant 0 : index
    %c0_75 = arith.constant 0 : index
    %89 = vector.load %arg20[%c0_73, %c0_74, %c0_75] : memref<2x8x64xf32, #tpu.memory_space<vmem>>, vector<2x1x64xf32>
    %c0_76 = arith.constant 0 : index
    %c0_77 = arith.constant 0 : index
    %c0_78 = arith.constant 0 : index
    %90 = vector.load %arg21[%c0_76, %c0_77, %c0_78] : memref<2x8x64xf32, #tpu.memory_space<vmem>>, vector<2x1x64xf32>
    %c0_79 = arith.constant 0 : index
    %c0_80 = arith.constant 0 : index
    %c0_81 = arith.constant 0 : index
    %c0_82 = arith.constant 0 : index
    %91 = vector.load %arg22[%c0_79, %c0_80, %c0_81, %c0_82] : memref<2x8x16x1xf32, #tpu.memory_space<vmem>>, vector<2x1x16x1xf32>
    %92 = vector.shape_cast %91 : vector<2x1x16x1xf32> to vector<2x16x1xf32>
    %93 = vector.broadcast %89 : vector<2x1x64xf32> to vector<2x16x64xf32>
    %94 = vector.broadcast %79 : vector<1x16x64xf32> to vector<2x16x64xf32>
    %95 = arith.mulf %93, %94 : vector<2x16x64xf32>
    %96 = math.exp %95 : vector<2x16x64xf32>
    %97 = arith.mulf %96, %88 : vector<2x16x64xf32>
    %98 = vector.broadcast %92 : vector<2x16x1xf32> to vector<2x16x64xf32>
    %99 = vector.broadcast %90 : vector<2x1x64xf32> to vector<2x16x64xf32>
    %100 = arith.mulf %98, %99 : vector<2x16x64xf32>
    %101 = arith.addf %97, %100 : vector<2x16x64xf32>
    %102 = vector.shape_cast %101 : vector<2x16x64xf32> to vector<2x1x16x64xf32>
    %c0_83 = arith.constant 0 : index
    %c0_84 = arith.constant 0 : index
    %c0_85 = arith.constant 0 : index
    %c0_86 = arith.constant 0 : index
    %103 = vector.load %arg23[%c0_83, %c0_84, %c0_85, %c0_86] : memref<2x8x16x64xf32, #tpu.memory_space<vmem>>, vector<2x1x16x64xf32>
    tpu.vector_store %arg23[%c0_83, %c0_84, %c0_85, %c0_86], %102 {strides = array<i32>} : memref<2x8x16x64xf32, #tpu.memory_space<vmem>>, vector<2x1x16x64xf32>,
    %c0_87 = arith.constant 0 : index
    %c1_88 = arith.constant 1 : index
    %c0_89 = arith.constant 0 : index
    %104 = vector.load %arg20[%c0_87, %c1_88, %c0_89] : memref<2x8x64xf32, #tpu.memory_space<vmem>>, vector<2x1x64xf32>
    %c0_90 = arith.constant 0 : index
    %c1_91 = arith.constant 1 : index
    %c0_92 = arith.constant 0 : index
    %105 = vector.load %arg21[%c0_90, %c1_91, %c0_92] : memref<2x8x64xf32, #tpu.memory_space<vmem>>, vector<2x1x64xf32>
    %c0_93 = arith.constant 0 : index
    %c1_94 = arith.constant 1 : index
    %c0_95 = arith.constant 0 : index
    %c0_96 = arith.constant 0 : index
    %106 = vector.load %arg22[%c0_93, %c1_94, %c0_95, %c0_96] : memref<2x8x16x1xf32, #tpu.memory_space<vmem>>, vector<2x1x16x1xf32>
    %107 = vector.shape_cast %106 : vector<2x1x16x1xf32> to vector<2x16x1xf32>
    %108 = vector.broadcast %104 : vector<2x1x64xf32> to vector<2x16x64xf32>
    %109 = vector.broadcast %79 : vector<1x16x64xf32> to vector<2x16x64xf32>
    %110 = arith.mulf %108, %109 : vector<2x16x64xf32>
    %111 = math.exp %110 : vector<2x16x64xf32>
    %112 = arith.mulf %111, %101 : vector<2x16x64xf32>
    %113 = vector.broadcast %107 : vector<2x16x1xf32> to vector<2x16x64xf32>
    %114 = vector.broadcast %105 : vector<2x1x64xf32> to vector<2x16x64xf32>
    %115 = arith.mulf %113, %114 : vector<2x16x64xf32>
    %116 = arith.addf %112, %115 : vector<2x16x64xf32>
    %117 = vector.shape_cast %116 : vector<2x16x64xf32> to vector<2x1x16x64xf32>
    %c0_97 = arith.constant 0 : index
    %c1_98 = arith.constant 1 : index
    %c0_99 = arith.constant 0 : index
    %c0_100 = arith.constant 0 : index
    %118 = vector.load %arg23[%c0_97, %c1_98, %c0_99, %c0_100] : memref<2x8x16x64xf32, #tpu.memory_space<vmem>>, vector<2x1x16x64xf32>
    tpu.vector_store %arg23[%c0_97, %c1_98, %c0_99, %c0_100], %117 {strides = array<i32>} : memref<2x8x16x64xf32, #tpu.memory_space<vmem>>, vector<2x1x16x64xf32>,
    %c0_101 = arith.constant 0 : index
    %c2_102 = arith.constant 2 : index
    %c0_103 = arith.constant 0 : index
    %119 = vector.load %arg20[%c0_101, %c2_102, %c0_103] : memref<2x8x64xf32, #tpu.memory_space<vmem>>, vector<2x1x64xf32>
    %c0_104 = arith.constant 0 : index
    %c2_105 = arith.constant 2 : index
    %c0_106 = arith.constant 0 : index
    %120 = vector.load %arg21[%c0_104, %c2_105, %c0_106] : memref<2x8x64xf32, #tpu.memory_space<vmem>>, vector<2x1x64xf32>
    %c0_107 = arith.constant 0 : index
    %c2_108 = arith.constant 2 : index
    %c0_109 = arith.constant 0 : index
    %c0_110 = arith.constant 0 : index
    %121 = vector.load %arg22[%c0_107, %c2_108, %c0_109, %c0_110] : memref<2x8x16x1xf32, #tpu.memory_space<vmem>>, vector<2x1x16x1xf32>
    %122 = vector.shape_cast %121 : vector<2x1x16x1xf32> to vector<2x16x1xf32>
    %123 = vector.broadcast %119 : vector<2x1x64xf32> to vector<2x16x64xf32>
    %124 = vector.broadcast %79 : vector<1x16x64xf32> to vector<2x16x64xf32>
    %125 = arith.mulf %123, %124 : vector<2x16x64xf32>
    %126 = math.exp %125 : vector<2x16x64xf32>
    %127 = arith.mulf %126, %116 : vector<2x16x64xf32>
    %128 = vector.broadcast %122 : vector<2x16x1xf32> to vector<2x16x64xf32>
    %129 = vector.broadcast %120 : vector<2x1x64xf32> to vector<2x16x64xf32>
    %130 = arith.mulf %128, %129 : vector<2x16x64xf32>
    %131 = arith.addf %127, %130 : vector<2x16x64xf32>
    %132 = vector.shape_cast %131 : vector<2x16x64xf32> to vector<2x1x16x64xf32>
    %c0_111 = arith.constant 0 : index
    %c2_112 = arith.constant 2 : index
    %c0_113 = arith.constant 0 : index
    %c0_114 = arith.constant 0 : index
    %133 = vector.load %arg23[%c0_111, %c2_112, %c0_113, %c0_114] : memref<2x8x16x64xf32, #tpu.memory_space<vmem>>, vector<2x1x16x64xf32>
    tpu.vector_store %arg23[%c0_111, %c2_112, %c0_113, %c0_114], %132 {strides = array<i32>} : memref<2x8x16x64xf32, #tpu.memory_space<vmem>>, vector<2x1x16x64xf32>,
    %c0_115 = arith.constant 0 : index
    %c3_116 = arith.constant 3 : index
    %c0_117 = arith.constant 0 : index
    %134 = vector.load %arg20[%c0_115, %c3_116, %c0_117] : memref<2x8x64xf32, #tpu.memory_space<vmem>>, vector<2x1x64xf32>
    %c0_118 = arith.constant 0 : index
    %c3_119 = arith.constant 3 : index
    %c0_120 = arith.constant 0 : index
    %135 = vector.load %arg21[%c0_118, %c3_119, %c0_120] : memref<2x8x64xf32, #tpu.memory_space<vmem>>, vector<2x1x64xf32>
    %c0_121 = arith.constant 0 : index
    %c3_122 = arith.constant 3 : index
    %c0_123 = arith.constant 0 : index
    %c0_124 = arith.constant 0 : index
    %136 = vector.load %arg22[%c0_121, %c3_122, %c0_123, %c0_124] : memref<2x8x16x1xf32, #tpu.memory_space<vmem>>, vector<2x1x16x1xf32>
    %137 = vector.shape_cast %136 : vector<2x1x16x1xf32> to vector<2x16x1xf32>
    %138 = vector.broadcast %134 : vector<2x1x64xf32> to vector<2x16x64xf32>
    %139 = vector.broadcast %79 : vector<1x16x64xf32> to vector<2x16x64xf32>
    %140 = arith.mulf %138, %139 : vector<2x16x64xf32>
    %141 = math.exp %140 : vector<2x16x64xf32>
    %142 = arith.mulf %141, %131 : vector<2x16x64xf32>
    %143 = vector.broadcast %137 : vector<2x16x1xf32> to vector<2x16x64xf32>
    %144 = vector.broadcast %135 : vector<2x1x64xf32> to vector<2x16x64xf32>
    %145 = arith.mulf %143, %144 : vector<2x16x64xf32>
    %146 = arith.addf %142, %145 : vector<2x16x64xf32>
    %147 = vector.shape_cast %146 : vector<2x16x64xf32> to vector<2x1x16x64xf32>
    %c0_125 = arith.constant 0 : index
    %c3_126 = arith.constant 3 : index
    %c0_127 = arith.constant 0 : index
    %c0_128 = arith.constant 0 : index
    %148 = vector.load %arg23[%c0_125, %c3_126, %c0_127, %c0_128] : memref<2x8x16x64xf32, #tpu.memory_space<vmem>>, vector<2x1x16x64xf32>
    tpu.vector_store %arg23[%c0_125, %c3_126, %c0_127, %c0_128], %147 {strides = array<i32>} : memref<2x8x16x64xf32, #tpu.memory_space<vmem>>, vector<2x1x16x64xf32>,
    %c0_129 = arith.constant 0 : index
    %c4 = arith.constant 4 : index
    %c0_130 = arith.constant 0 : index
    %149 = vector.load %arg20[%c0_129, %c4, %c0_130] : memref<2x8x64xf32, #tpu.memory_space<vmem>>, vector<2x1x64xf32>
    %c0_131 = arith.constant 0 : index
    %c4_132 = arith.constant 4 : index
    %c0_133 = arith.constant 0 : index
    %150 = vector.load %arg21[%c0_131, %c4_132, %c0_133] : memref<2x8x64xf32, #tpu.memory_space<vmem>>, vector<2x1x64xf32>
    %c0_134 = arith.constant 0 : index
    %c4_135 = arith.constant 4 : index
    %c0_136 = arith.constant 0 : index
    %c0_137 = arith.constant 0 : index
    %151 = vector.load %arg22[%c0_134, %c4_135, %c0_136, %c0_137] : memref<2x8x16x1xf32, #tpu.memory_space<vmem>>, vector<2x1x16x1xf32>
    %152 = vector.shape_cast %151 : vector<2x1x16x1xf32> to vector<2x16x1xf32>
    %153 = vector.broadcast %149 : vector<2x1x64xf32> to vector<2x16x64xf32>
    %154 = vector.broadcast %79 : vector<1x16x64xf32> to vector<2x16x64xf32>
    %155 = arith.mulf %153, %154 : vector<2x16x64xf32>
    %156 = math.exp %155 : vector<2x16x64xf32>
    %157 = arith.mulf %156, %146 : vector<2x16x64xf32>
    %158 = vector.broadcast %152 : vector<2x16x1xf32> to vector<2x16x64xf32>
    %159 = vector.broadcast %150 : vector<2x1x64xf32> to vector<2x16x64xf32>
    %160 = arith.mulf %158, %159 : vector<2x16x64xf32>
    %161 = arith.addf %157, %160 : vector<2x16x64xf32>
    %162 = vector.shape_cast %161 : vector<2x16x64xf32> to vector<2x1x16x64xf32>
    %c0_138 = arith.constant 0 : index
    %c4_139 = arith.constant 4 : index
    %c0_140 = arith.constant 0 : index
    %c0_141 = arith.constant 0 : index
    %163 = vector.load %arg23[%c0_138, %c4_139, %c0_140, %c0_141] : memref<2x8x16x64xf32, #tpu.memory_space<vmem>>, vector<2x1x16x64xf32>
    tpu.vector_store %arg23[%c0_138, %c4_139, %c0_140, %c0_141], %162 {strides = array<i32>} : memref<2x8x16x64xf32, #tpu.memory_space<vmem>>, vector<2x1x16x64xf32>,
    %c0_142 = arith.constant 0 : index
    %c5 = arith.constant 5 : index
    %c0_143 = arith.constant 0 : index
    %164 = vector.load %arg20[%c0_142, %c5, %c0_143] : memref<2x8x64xf32, #tpu.memory_space<vmem>>, vector<2x1x64xf32>
    %c0_144 = arith.constant 0 : index
    %c5_145 = arith.constant 5 : index
    %c0_146 = arith.constant 0 : index
    %165 = vector.load %arg21[%c0_144, %c5_145, %c0_146] : memref<2x8x64xf32, #tpu.memory_space<vmem>>, vector<2x1x64xf32>
    %c0_147 = arith.constant 0 : index
    %c5_148 = arith.constant 5 : index
    %c0_149 = arith.constant 0 : index
    %c0_150 = arith.constant 0 : index
    %166 = vector.load %arg22[%c0_147, %c5_148, %c0_149, %c0_150] : memref<2x8x16x1xf32, #tpu.memory_space<vmem>>, vector<2x1x16x1xf32>
    %167 = vector.shape_cast %166 : vector<2x1x16x1xf32> to vector<2x16x1xf32>
    %168 = vector.broadcast %164 : vector<2x1x64xf32> to vector<2x16x64xf32>
    %169 = vector.broadcast %79 : vector<1x16x64xf32> to vector<2x16x64xf32>
    %170 = arith.mulf %168, %169 : vector<2x16x64xf32>
    %171 = math.exp %170 : vector<2x16x64xf32>
    %172 = arith.mulf %171, %161 : vector<2x16x64xf32>
    %173 = vector.broadcast %167 : vector<2x16x1xf32> to vector<2x16x64xf32>
    %174 = vector.broadcast %165 : vector<2x1x64xf32> to vector<2x16x64xf32>
    %175 = arith.mulf %173, %174 : vector<2x16x64xf32>
    %176 = arith.addf %172, %175 : vector<2x16x64xf32>
    %177 = vector.shape_cast %176 : vector<2x16x64xf32> to vector<2x1x16x64xf32>
    %c0_151 = arith.constant 0 : index
    %c5_152 = arith.constant 5 : index
    %c0_153 = arith.constant 0 : index
    %c0_154 = arith.constant 0 : index
    %178 = vector.load %arg23[%c0_151, %c5_152, %c0_153, %c0_154] : memref<2x8x16x64xf32, #tpu.memory_space<vmem>>, vector<2x1x16x64xf32>
    tpu.vector_store %arg23[%c0_151, %c5_152, %c0_153, %c0_154], %177 {strides = array<i32>} : memref<2x8x16x64xf32, #tpu.memory_space<vmem>>, vector<2x1x16x64xf32>,
    %c0_155 = arith.constant 0 : index
    %c6 = arith.constant 6 : index
    %c0_156 = arith.constant 0 : index
    %179 = vector.load %arg20[%c0_155, %c6, %c0_156] : memref<2x8x64xf32, #tpu.memory_space<vmem>>, vector<2x1x64xf32>
    %c0_157 = arith.constant 0 : index
    %c6_158 = arith.constant 6 : index
    %c0_159 = arith.constant 0 : index
    %180 = vector.load %arg21[%c0_157, %c6_158, %c0_159] : memref<2x8x64xf32, #tpu.memory_space<vmem>>, vector<2x1x64xf32>
    %c0_160 = arith.constant 0 : index
    %c6_161 = arith.constant 6 : index
    %c0_162 = arith.constant 0 : index
    %c0_163 = arith.constant 0 : index
    %181 = vector.load %arg22[%c0_160, %c6_161, %c0_162, %c0_163] : memref<2x8x16x1xf32, #tpu.memory_space<vmem>>, vector<2x1x16x1xf32>
    %182 = vector.shape_cast %181 : vector<2x1x16x1xf32> to vector<2x16x1xf32>
    %183 = vector.broadcast %179 : vector<2x1x64xf32> to vector<2x16x64xf32>
    %184 = vector.broadcast %79 : vector<1x16x64xf32> to vector<2x16x64xf32>
    %185 = arith.mulf %183, %184 : vector<2x16x64xf32>
    %186 = math.exp %185 : vector<2x16x64xf32>
    %187 = arith.mulf %186, %176 : vector<2x16x64xf32>
    %188 = vector.broadcast %182 : vector<2x16x1xf32> to vector<2x16x64xf32>
    %189 = vector.broadcast %180 : vector<2x1x64xf32> to vector<2x16x64xf32>
    %190 = arith.mulf %188, %189 : vector<2x16x64xf32>
    %191 = arith.addf %187, %190 : vector<2x16x64xf32>
    %192 = vector.shape_cast %191 : vector<2x16x64xf32> to vector<2x1x16x64xf32>
    %c0_164 = arith.constant 0 : index
    %c6_165 = arith.constant 6 : index
    %c0_166 = arith.constant 0 : index
    %c0_167 = arith.constant 0 : index
    %193 = vector.load %arg23[%c0_164, %c6_165, %c0_166, %c0_167] : memref<2x8x16x64xf32, #tpu.memory_space<vmem>>, vector<2x1x16x64xf32>
    tpu.vector_store %arg23[%c0_164, %c6_165, %c0_166, %c0_167], %192 {strides = array<i32>} : memref<2x8x16x64xf32, #tpu.memory_space<vmem>>, vector<2x1x16x64xf32>,
    %c0_168 = arith.constant 0 : index
    %c7 = arith.constant 7 : index
    %c0_169 = arith.constant 0 : index
    %194 = vector.load %arg20[%c0_168, %c7, %c0_169] : memref<2x8x64xf32, #tpu.memory_space<vmem>>, vector<2x1x64xf32>
    %c0_170 = arith.constant 0 : index
    %c7_171 = arith.constant 7 : index
    %c0_172 = arith.constant 0 : index
    %195 = vector.load %arg21[%c0_170, %c7_171, %c0_172] : memref<2x8x64xf32, #tpu.memory_space<vmem>>, vector<2x1x64xf32>
    %c0_173 = arith.constant 0 : index
    %c7_174 = arith.constant 7 : index
    %c0_175 = arith.constant 0 : index
    %c0_176 = arith.constant 0 : index
    %196 = vector.load %arg22[%c0_173, %c7_174, %c0_175, %c0_176] : memref<2x8x16x1xf32, #tpu.memory_space<vmem>>, vector<2x1x16x1xf32>
    %197 = vector.shape_cast %196 : vector<2x1x16x1xf32> to vector<2x16x1xf32>
    %198 = vector.broadcast %194 : vector<2x1x64xf32> to vector<2x16x64xf32>
    %199 = vector.broadcast %79 : vector<1x16x64xf32> to vector<2x16x64xf32>
    %200 = arith.mulf %198, %199 : vector<2x16x64xf32>
    %201 = math.exp %200 : vector<2x16x64xf32>
    %202 = arith.mulf %201, %191 : vector<2x16x64xf32>
    %203 = vector.broadcast %197 : vector<2x16x1xf32> to vector<2x16x64xf32>
    %204 = vector.broadcast %195 : vector<2x1x64xf32> to vector<2x16x64xf32>
    %205 = arith.mulf %203, %204 : vector<2x16x64xf32>
    %206 = arith.addf %202, %205 : vector<2x16x64xf32>
    %207 = vector.shape_cast %206 : vector<2x16x64xf32> to vector<2x1x16x64xf32>
    %c0_177 = arith.constant 0 : index
    %c7_178 = arith.constant 7 : index
    %c0_179 = arith.constant 0 : index
    %c0_180 = arith.constant 0 : index
    %208 = vector.load %arg23[%c0_177, %c7_178, %c0_179, %c0_180] : memref<2x8x16x64xf32, #tpu.memory_space<vmem>>, vector<2x1x16x64xf32>
    tpu.vector_store %arg23[%c0_177, %c7_178, %c0_179, %c0_180], %207 {strides = array<i32>} : memref<2x8x16x64xf32, #tpu.memory_space<vmem>>, vector<2x1x16x64xf32>,
    %209 = vector.shape_cast %60 : vector<16x16xf32> to vector<2x8x16xf32>
    %210 = vector.shape_cast %209 : vector<2x8x16xf32> to vector<2x8x16x1xf32>
    %c0_181 = arith.constant 0 : index
    %c0_182 = arith.constant 0 : index
    %c0_183 = arith.constant 0 : index
    %c0_184 = arith.constant 0 : index
    %211 = vector.load %arg23[%c0_181, %c0_182, %c0_183, %c0_184] : memref<2x8x16x64xf32, #tpu.memory_space<vmem>>, vector<2x8x16x64xf32>
    %212 = vector.broadcast %210 : vector<2x8x16x1xf32> to vector<2x8x16x64xf32>
    %213 = arith.mulf %212, %211 : vector<2x8x16x64xf32>
    %cst_185 = arith.constant dense<0.000000e+00> : vector<2x8x64xf32>
    %214 = vector.multi_reduction <add>, %213, %cst_185 [2] : vector<2x8x16x64xf32> to vector<2x8x64xf32>
    %215 = vector.shape_cast %214 : vector<2x8x64xf32> to vector<16x64xf32>
    %c0_186 = arith.constant 0 : index
    %c0_187 = arith.constant 0 : index
    %216 = vector.load %arg14[%c0_186, %c0_187] : memref<1x64xf32, #tpu.memory_space<vmem>>, vector<1x64xf32>
    %217 = vector.broadcast %216 : vector<1x64xf32> to vector<16x64xf32>
    %218 = arith.mulf %54, %217 : vector<16x64xf32>
    %219 = arith.addf %215, %218 : vector<16x64xf32>
    %cst_188 = arith.constant 0.000000e+00 : f32
    %220 = vector.broadcast %cst_188 : f32 to vector<16x64xf32>
    %221 = arith.subf %220, %12 : vector<16x64xf32>
    %222 = math.exp %221 : vector<16x64xf32>
    %cst_189 = arith.constant 1.000000e+00 : f32
    %223 = vector.broadcast %cst_189 : f32 to vector<16x64xf32>
    %224 = arith.addf %223, %222 : vector<16x64xf32>
    %cst_190 = arith.constant 1.000000e+00 : f32
    %225 = vector.broadcast %cst_190 : f32 to vector<16x64xf32>
    %226 = arith.divf %225, %224 : vector<16x64xf32>
    %227 = arith.mulf %12, %226 : vector<16x64xf32>
    %228 = arith.mulf %219, %227 : vector<16x64xf32>
    %229 = arith.truncf %228 : vector<16x64xf32> to vector<16x64xbf16>
    %c0_191 = arith.constant 0 : index
    %c0_192 = arith.constant 0 : index
    %230 = vector.load %arg15[%c0_191, %c0_192] : memref<64x32xbf16, #tpu.memory_space<vmem>>, vector<64x32xbf16>
    %cst_193 = arith.constant dense<0.000000e+00> : vector<16x32xf32>
    %231 = tpu.matmul %229, %230, %cst_193 {dimension_numbers = #tpu.dot_dimension_numbers<[1], [0], [0], [1], [0, 0, 1, 1], [], []>} : vector<16x64xbf16>, vector<64x32xbf16>, vector<16x32xf32> -> vector<16x32xf32>
    %232 = arith.truncf %231 : vector<16x32xf32> to vector<16x32xbf16>
    %c0_194 = arith.constant 0 : index
    %c0_195 = arith.constant 0 : index
    %233 = vector.load %arg16[%c0_194, %c0_195] : memref<32x16xbf16, #tpu.memory_space<vmem>>, vector<32x16xbf16>
    %cst_196 = arith.constant dense<0.000000e+00> : vector<16x16xf32>
    %234 = tpu.matmul %232, %233, %cst_196 {dimension_numbers = #tpu.dot_dimension_numbers<[1], [0], [0], [1], [0, 0, 1, 1], [], []>} : vector<16x32xbf16>, vector<32x16xbf16>, vector<16x16xf32> -> vector<16x16xf32>
    %c0_197 = arith.constant 0 : index
    %c0_198 = arith.constant 0 : index
    %235 = vector.load %arg17[%c0_197, %c0_198] : memref<1x16xf32, #tpu.memory_space<vmem>>, vector<1x16xf32>
    %236 = vector.broadcast %235 : vector<1x16xf32> to vector<16x16xf32>
    %237 = arith.addf %234, %236 : vector<16x16xf32>
    %238 = vector.shape_cast %237 : vector<16x16xf32> to vector<2x8x16xf32>
    %c0_199 = arith.constant 0 : index
    %c0_200 = arith.constant 0 : index
    %c0_201 = arith.constant 0 : index
    %239 = vector.load %arg18[%c0_199, %c0_200, %c0_201] : memref<2x8x16xf32, #tpu.memory_space<vmem>>, vector<2x8x16xf32>
    tpu.vector_store %arg18[%c0_199, %c0_200, %c0_201], %238 {strides = array<i32>} : memref<2x8x16xf32, #tpu.memory_space<vmem>>, vector<2x8x16xf32>,
    return
  }
  func.func @transform_0(%arg0: i32) -> (i32, i32, i32) {
    %c0_i32 = arith.constant 0 : i32
    %c0_i32_0 = arith.constant 0 : i32
    %c0_i32_1 = arith.constant 0 : i32
    return %arg0, %c0_i32, %c0_i32_0 : i32, i32, i32
  }
  func.func @transform_1(%arg0: i32) -> (i32, i32) {
    %c0_i32 = arith.constant 0 : i32
    %c0_i32_0 = arith.constant 0 : i32
    %c0_i32_1 = arith.constant 0 : i32
    return %c0_i32, %c0_i32_0 : i32, i32
  }
  func.func @transform_2(%arg0: i32) -> (i32, i32) {
    %c0_i32 = arith.constant 0 : i32
    %c0_i32_0 = arith.constant 0 : i32
    %c0_i32_1 = arith.constant 0 : i32
    return %c0_i32, %c0_i32_0 : i32, i32
  }
  func.func @transform_3(%arg0: i32) -> (i32, i32) {
    %c0_i32 = arith.constant 0 : i32
    %c0_i32_0 = arith.constant 0 : i32
    %c0_i32_1 = arith.constant 0 : i32
    return %c0_i32, %c0_i32_0 : i32, i32
  }
  func.func @transform_4(%arg0: i32) -> (i32, i32) {
    %c0_i32 = arith.constant 0 : i32
    %c0_i32_0 = arith.constant 0 : i32
    %c0_i32_1 = arith.constant 0 : i32
    return %c0_i32, %c0_i32_0 : i32, i32
  }
  func.func @transform_5(%arg0: i32) -> (i32, i32) {
    %c0_i32 = arith.constant 0 : i32
    %c0_i32_0 = arith.constant 0 : i32
    %c0_i32_1 = arith.constant 0 : i32
    return %c0_i32, %c0_i32_0 : i32, i32
  }
  func.func @transform_6(%arg0: i32) -> (i32, i32) {
    %c0_i32 = arith.constant 0 : i32
    %c0_i32_0 = arith.constant 0 : i32
    %c0_i32_1 = arith.constant 0 : i32
    return %c0_i32, %c0_i32_0 : i32, i32
  }
  func.func @transform_7(%arg0: i32) -> (i32, i32) {
    %c0_i32 = arith.constant 0 : i32
    %c0_i32_0 = arith.constant 0 : i32
    %c0_i32_1 = arith.constant 0 : i32
    return %c0_i32, %c0_i32_0 : i32, i32
  }
  func.func @transform_8(%arg0: i32) -> (i32, i32) {
    %c0_i32 = arith.constant 0 : i32
    %c0_i32_0 = arith.constant 0 : i32
    %c0_i32_1 = arith.constant 0 : i32
    return %c0_i32, %c0_i32_0 : i32, i32
  }
  func.func @transform_9(%arg0: i32) -> (i32, i32) {
    %c0_i32 = arith.constant 0 : i32
    %c0_i32_0 = arith.constant 0 : i32
    %c0_i32_1 = arith.constant 0 : i32
    return %c0_i32, %c0_i32_0 : i32, i32
  }
  func.func @transform_10(%arg0: i32) -> (i32, i32) {
    %c0_i32 = arith.constant 0 : i32
    %c0_i32_0 = arith.constant 0 : i32
    %c0_i32_1 = arith.constant 0 : i32
    return %c0_i32, %c0_i32_0 : i32, i32
  }
  func.func @transform_11(%arg0: i32) -> (i32, i32) {
    %c0_i32 = arith.constant 0 : i32
    %c0_i32_0 = arith.constant 0 : i32
    %c0_i32_1 = arith.constant 0 : i32
    return %c0_i32, %c0_i32_0 : i32, i32
  }
  func.func @transform_12(%arg0: i32) -> (i32, i32) {
    %c0_i32 = arith.constant 0 : i32
    %c0_i32_0 = arith.constant 0 : i32
    %c0_i32_1 = arith.constant 0 : i32
    return %c0_i32, %c0_i32_0 : i32, i32
  }
  func.func @transform_13(%arg0: i32) -> (i32, i32) {
    %c0_i32 = arith.constant 0 : i32
    %c0_i32_0 = arith.constant 0 : i32
    %c0_i32_1 = arith.constant 0 : i32
    return %c0_i32, %c0_i32_0 : i32, i32
  }
  func.func @transform_14(%arg0: i32) -> (i32, i32) {
    %c0_i32 = arith.constant 0 : i32
    %c0_i32_0 = arith.constant 0 : i32
    %c0_i32_1 = arith.constant 0 : i32
    return %c0_i32, %c0_i32_0 : i32, i32
  }
  func.func @transform_15(%arg0: i32) -> (i32, i32) {
    %c0_i32 = arith.constant 0 : i32
    %c0_i32_0 = arith.constant 0 : i32
    %c0_i32_1 = arith.constant 0 : i32
    return %c0_i32, %c0_i32_0 : i32, i32
  }
  func.func @transform_16(%arg0: i32) -> (i32, i32) {
    %c0_i32 = arith.constant 0 : i32
    %c0_i32_0 = arith.constant 0 : i32
    %c0_i32_1 = arith.constant 0 : i32
    return %c0_i32, %c0_i32_0 : i32, i32
  }
  func.func @transform_17(%arg0: i32) -> (i32, i32, i32) {
    %c0_i32 = arith.constant 0 : i32
    %c0_i32_0 = arith.constant 0 : i32
    %c0_i32_1 = arith.constant 0 : i32
    return %arg0, %c0_i32, %c0_i32_0 : i32, i32, i32
  }
}

</mosaic_0001>

<bundles_post_ra>
// kernel: tpu_custom_call.1
= control target key start
LH: loop header
LB: loop body
LE: loop exit
PB: predicated region body
PF: predicated region fallthrough
CT: control target
= control target key end

     0   :  { %s3468_s0 = inlined_call_operand.vmem [shape: f32[2,8,16], index: 0, kind: input, shape index: {}]   ;;  %s3469_s1 = inlined_call_operand.vmem [shape: bf16[16,32], index: 1, kind: input, shape index: {}]   ;;  %s3470_s2 = inlined_call_operand.vmem [shape: f32[1,32], index: 2, kind: input, shape index: {}]   ;;  %s3471_s3 = inlined_call_operand.vmem [shape: bf16[32,64], index: 3, kind: input, shape index: {}]   ;;  %s3472_s4 = inlined_call_operand.vmem [shape: bf16[32,64], index: 4, kind: input, shape index: {}]   ;;  %s3473_s5 = inlined_call_operand.vmem [shape: f32[4,64], index: 5, kind: input, shape index: {}]   ;;  %s3474_s6 = inlined_call_operand.vmem [shape: f32[1,64], index: 6, kind: input, shape index: {}]   ;;  %s3475_s7 = inlined_call_operand.vmem [shape: f32[64,2], index: 7, kind: input, shape index: {}]   ;;  %s3476_s8 = inlined_call_operand.vmem [shape: f32[64,16], index: 8, kind: input, shape index: {}]   ;;  %s3477_s9 = inlined_call_operand.vmem [shape: f32[64,16], index: 9, kind: input, shape index: {}]   ;;  %s3478_s10 = inlined_call_operand.vmem [shape: f32[2,64], index: 10, kind: input, shape index: {}]   ;;  %s3479_s11 = inlined_call_operand.vmem [shape: f32[1,64], index: 11, kind: input, shape index: {}]   ;;  %s3480_s12 = inlined_call_operand.vmem [shape: f32[16,64], index: 12, kind: input, shape index: {}]   ;;  %s3481_s13 = inlined_call_operand.vmem [shape: f32[1,64], index: 13, kind: input, shape index: {}]   ;;  %s3482_s14 = inlined_call_operand.vmem [shape: bf16[64,32], index: 14, kind: input, shape index: {}]   ;;  %s3483_s15 = inlined_call_operand.vmem [shape: bf16[32,16], index: 15, kind: input, shape index: {}]   ;;  %s3484_s16 = inlined_call_operand.vmem [shape: f32[1,16], index: 16, kind: input, shape index: {}]   ;;  %s3485_s17 = inlined_call_operand.hbm [shape: f32[2,8,16], index: 17, kind: output, shape index: {}]  }
   0x1   :  { %3495 = sst [smem:[#allocation18_spill]] %s3468_s0 }
   0x2   :  { %3496 = sst [smem:[#allocation19_spill]] %s3469_s1 }
   0x3   :  { %s3497_s26 = sld [smem:[#allocation19_spill]]  ;;  %v2643_v1 = vmov 0.0   ;;  %s3498_s29 = sld [smem:[#allocation18_spill]]  ;;  %vm76_vm0 = vcmask 130048   ;;  %vm2644_vm1 = vmmov 0  }
   0x4   :  { %2356 = vmatprep.subr.bf16.mxu0 %v2643_v1  ;;  %2362 = vmatprep.subr.bf16.mxu1 %v2643_v1 }
   0x5   :  { %2358 = vmatprep.mubr.msk.bf16.mxu0 %vm2644_vm1, %v2643_v1  ;;  %2366 = vmatprep.mubr.msk.bf16.mxu1 %vm2644_vm1, %v2643_v1 }
   0x9   :  { %v2516_v0 = vld [vmem:[%s3497_s26] sm:$0xff]   ;;  %v59_v3 = vld [vmem:[%s3498_s29 + $0x8] sm:$0xff] }
   0xa   :  { %v58_v2 = vld [vmem:[%s3498_s29] sm:$0xff]  ;;  %2357 = vmatpush3.bf16.msra.mxu0 %v2516_v0 }
   0xb   :  { %v60_v4 = vpack.c.bf16 %v59_v3, %v58_v2  ;;  %2370 = vmatprep.subr.bf16.mxu0 %v2643_v1 }
   0xd   :  { %2359 = vmatmul.mubr.msk.bf16.vlgmr.msra.gmra.mrb[0].mxu0 %vm76_vm0, %v60_v4 }
   0xe   :  { %2374 = vmatprep.mubr.msk.bf16.mxu0 %vm2644_vm1, %v2643_v1 }
   0xf   :  { %22 = vsyncpa [#allocation8], 0  ;;  %v2517_v5 = vld [vmem:[%s3471_s3] sm:$0xff]   ;;  %v2519_v7 = vld [vmem:[%s3471_s3 + $0x8] sm:$0xff]   ;;  %vm138_vm2 = vcmask 261120   ;;  %vm240_vm3 = vcmask 523264  }
  0x10   :  { %v2518_v6 = vld [vmem:[%s3472_s4] sm:$0xff]   ;;  %2363 = vmatpush3.bf16.msra.mxu1 %v2517_v5  ;;  %v2520_v8 = vld [vmem:[%s3472_s4 + $0x8] sm:$0xff]   ;;  %vm242_vm4 = vcmask 518144   ;;  %241 = vst.msk [vmem:[#allocation2] sm:$0xff] %vm240_vm3, %v2643_v1  ;;  %244 = vst.msk [vmem:[#allocation2 + $0x10] sm:$0xff] %vm240_vm3, %v2643_v1  ;;  %vm584_vm5 = vcmask 1041408  }
  0x11   :  { %2371 = vmatpush3.bf16.msra.mxu0 %v2518_v6  ;;  %2364 = vmatprep.subr.bf16.mxu1 %v2643_v1  ;;  %v2241_v9 = vld [vmem:[%s3470_s2] ss:$0 sm:$0xff]  ;;  %243 = vst.msk [vmem:[#allocation2 + $0x8] sm:$0x7] %vm242_vm4, %v2643_v1  ;;  %245 = vst.msk [vmem:[#allocation2 + $0x18] sm:$0x7] %vm242_vm4, %v2643_v1 }
  0x12   :  { %2372 = vmatprep.subr.bf16.mxu0 %v2643_v1  ;;  %v314_v17 = vld [vmem:[%s3475_s7] sm:$0xff]  ;;  %v315_v18 = vld [vmem:[%s3475_s7 + $0x8] sm:$0xff]  ;;  %v316_v23 = vld [vmem:[%s3475_s7 + $0x10] sm:$0xff]  ;;  %vm577_vm6 = vcmask 15360   ;;  %vm869_vm7 = vcmask 7168   ;;  %vm2052_vm10 = vcmask 1041409  }
  0x13   :  { %v2460_v19 = vpack.c.bf16 %v315_v18, %v314_v17  ;;  %v403_v20 = vld [vmem:[%s3476_s8] sm:$0xff]  ;;  %v404_v21 = vld [vmem:[%s3476_s8 + $0x8] sm:$0xff]  ;;  %v317_v24 = vld [vmem:[%s3475_s7 + $0x18] sm:$0xff]  ;;  %vm2055_vm11 = vcmask 1042434   ;;  %vm2058_vm12 = vcmask 1043459   ;;  %vm2061_vm13 = vcmask 1044484  }
  0x14   :  { %2365 = vmatpush3.bf16.msra.mxu1 %v2519_v7  ;;  %v2476_v22 = vpack.c.bf16 %v404_v21, %v403_v20  ;;  %v405_v25 = vld [vmem:[%s3476_s8 + $0x10] sm:$0xff]  ;;  %v2464_v26 = vpack.c.bf16 %v317_v24, %v316_v23  ;;  %v406_v27 = vld [vmem:[%s3476_s8 + $0x18] sm:$0xff]  ;;  %v318_v28 = vld [vmem:[%s3475_s7 + $0x20] sm:$0xff]  ;;  %vm2064_vm14 = vcmask 1045509   ;;  %vm2067_vm15 = vcmask 1046534  }
  0x15   :  { %2373 = vmatpush3.bf16.msra.mxu0 %v2520_v8  ;;  %2461 = vmatprep.subr.bf16.mxu1 %v2460_v19  ;;  %v319_v29 = vld [vmem:[%s3475_s7 + $0x28] sm:$0xff]  ;;  %v2480_v30 = vpack.c.bf16 %v406_v27, %v405_v25  ;;  %v407_v31 = vld [vmem:[%s3476_s8 + $0x20] sm:$0xff]  ;;  %v320_v35 = vld [vmem:[%s3475_s7 + $0x30] sm:$0xff] }
  0x16   :  { %2477 = vmatprep.subr.bf16.mxu0 %v2476_v22  ;;  %v408_v32 = vld [vmem:[%s3476_s8 + $0x28] sm:$0xff]  ;;  %v2468_v33 = vpack.c.bf16 %v319_v29, %v318_v28  ;;  %v321_v36 = vld [vmem:[%s3475_s7 + $0x38] sm:$0xff]  ;;  %v409_v37 = vld [vmem:[%s3476_s8 + $0x30] sm:$0xff]  ;;  %s2646_s7 = smov [#allocation7]  }
  0x17   :  { %v2484_v34 = vpack.c.bf16 %v408_v32, %v407_v31  ;;  %v410_v38 = vld [vmem:[%s3476_s8 + $0x38] sm:$0xff]  ;;  %v2472_v39 = vpack.c.bf16 %v321_v36, %v320_v35  ;;  %v486_v41 = vld [vmem:[%s3477_s9] sm:$0xff]  ;;  %v487_v42 = vld [vmem:[%s3477_s9 + $0x8] sm:$0xff]  ;;  %s2230_s23 = sshll.u32 %s2646_s7, 4  ;;  %s2231_s23 = int_to_ptr.vmem [resolvable:$true] %s2230_s23 }
  0x18   :  { %v2488_v40 = vpack.c.bf16 %v410_v38, %v409_v37  ;;  %v2837_v43 = vpack.c.bf16 %v487_v42, %v486_v41  ;;  %v2251_v52 = vld [vmem:[%s3473_s5] ss:$0 sm:$0xff]  ;;  %v2252_v53 = vld [vmem:[%s3473_s5 + $0x1] ss:$0 sm:$0xff]  ;;  %v2253_v58 = vld [vmem:[%s3473_s5 + $0x2] ss:$0 sm:$0xff]  ;;  %p2624_p1 = scmp.lt.s32.totalorder %s2231_s23, %s2231_s23 }
  0x19   :  { %v2250_v54 = vld [vmem:[%s3474_s6] ss:$0 sm:$0xff]  ;;  %v2254_v3 = vld [vmem:[%s3473_s5 + $0x3] ss:$0 sm:$0xff]  ;;  %v488_v27 = vld [vmem:[%s3477_s9 + $0x10] sm:$0xff]  ;;  %v2645_v42 = vmov 0  }
  0x1a   :  { %v489_v28 = vld [vmem:[%s3477_s9 + $0x18] sm:$0xff]  ;;  %v492_v36 = vld [vmem:[%s3477_s9 + $0x30] sm:$0xff]  ;;  %2514 = vset.pattern.permute.xlu1 %v2645_v42  ;;  %2515 = vset.pattern.permute.xlu0 %v2645_v42 }
  0x1b   :  { %v2496_v32 = vpack.c.bf16 %v489_v28, %v488_v27  ;;  %v493_v37 = vld [vmem:[%s3477_s9 + $0x38] sm:$0xff] }
  0x1c   :  { %v2504_v38 = vpack.c.bf16 %v493_v37, %v492_v36 }
  0xe0   :  { %v114_v10 = vpop.f32.mrb[0].mxu0 }
  0xe1   :  { %v2360_v11 = vpop.f32.mrb[1].mxu0  ;;  %v115_v13 = vadd.f32 %v2241_v9, %v114_v10 }
  0xe2   :  { %v117_v12 = vpop.f32.mrb[2].mxu0 }
  0xe3   :  { %v118_v14 = vadd.f32 %v2241_v9, %v117_v12  ;;  %v2361_v15 = vpop.f32.mrb[3].mxu0 }
  0xe5   :  { %v121_v16 = vpack.c.bf16 %v118_v14, %v115_v13 }
  0xe7   :  { %2367 = vmatmul.mubr.msk.bf16.vlgmr.msra.gmra.mrb[0].mxu1 %vm138_vm2, %v121_v16  ;;  %2375 = vmatmul.mubr.msk.bf16.vlgmr.msra.gmra.mrb[4].mxu0 %vm138_vm2, %v121_v16 }
  0xe8   :  { %2463 = vmatpush3.bf16.msra.mxu1 %v2460_v19  ;;  %2479 = vmatpush3.bf16.msra.mxu0 %v2476_v22 }
  0xe9   :  { %2465 = vmatprep.subr.bf16.mxu1 %v2464_v26  ;;  %2481 = vmatprep.subr.bf16.mxu0 %v2480_v30 }
  0xec   :  { %2467 = vmatpush3.bf16.msra.mxu1 %v2464_v26  ;;  %2483 = vmatpush3.bf16.msra.mxu0 %v2480_v30 }
  0xed   :  { %2469 = vmatprep.subr.bf16.mxu1 %v2468_v33  ;;  %2485 = vmatprep.subr.bf16.mxu0 %v2484_v34 }
  0xf0   :  { %2471 = vmatpush3.bf16.msra.mxu1 %v2468_v33  ;;  %2487 = vmatpush3.bf16.msra.mxu0 %v2484_v34  ;;  %v490_v33 = vld [vmem:[%s3477_s9 + $0x20] sm:$0xff]  ;;  %v491_v34 = vld [vmem:[%s3477_s9 + $0x28] sm:$0xff] }
  0xf1   :  { %2473 = vmatprep.subr.bf16.mxu1 %v2472_v39  ;;  %2489 = vmatprep.subr.bf16.mxu0 %v2488_v40  ;;  %v2500_v35 = vpack.c.bf16 %v491_v34, %v490_v33 }
  0xf4   :  { %2475 = vmatpush3.bf16.msra.mxu1 %v2472_v39  ;;  %2491 = vmatpush3.bf16.msra.mxu0 %v2488_v40  ;;  %v569_v39 = vld [vmem:[%s3478_s10] sm:$0x3]  ;;  %v693_v40 = vlaneseq }
  0xf5   :  { %2493 = vmatprep.subr.bf16.mxu1 %v2837_v43  ;;  %2435 = vmatprep.subr.msk.mxu0 %vm584_vm5, %v569_v39 }
  0xf6   :  { %v694_v41 = vshrl.u32 %v693_v40, 7 }
 0x1ba   :  { %v176_v44 = vpop.f32.mrb[0].mxu1  ;;  %v2840_v45 = vpop.f32.mrb[4].mxu0 }
 0x1bb   :  { %246 = vst.msk [vmem:[#allocation2 + $0x3] sm:$0xff] %vm240_vm3, %v176_v44  ;;  %v2368_v46 = vpop.f32.mrb[1].mxu1  ;;  %v2376_v47 = vpop.f32.mrb[5].mxu0  ;;  %v695_v44 = vsub.s32 0, %v694_v41 }
 0x1bc   :  { %v179_v48 = vpop.f32.mrb[2].mxu1  ;;  %v2843_v49 = vpop.f32.mrb[6].mxu0 }
 0x1bd   :  { %247 = vst.msk [vmem:[#allocation2 + $0x13] sm:$0xff] %vm240_vm3, %v179_v48  ;;  %v2369_v50 = vpop.f32.mrb[3].mxu1  ;;  %v2377_v51 = vpop.f32.mrb[7].mxu0 }
 0x1c2   :  { %v256_v55 = vld [vmem:[#allocation2] sm:$0xff] }
 0x1c3   :  { %v267_v56 = vld [vmem:[#allocation2 + $0x1] sm:$0xff]  ;;  %v263_v57 = vmul.f32 %v2251_v52, %v256_v55  ;;  %v728_v55 = vsub.s32 3, %v694_v41 }
 0x1c4   :  { %v278_v59 = vld [vmem:[#allocation2 + $0x2] sm:$0xff]  ;;  %v257_v60 = vld [vmem:[#allocation2 + $0x10] sm:$0xff]  ;;  %v274_v63 = vmul.f32 %v2252_v53, %v267_v56 }
 0x1c5   :  { %v268_v61 = vld [vmem:[#allocation2 + $0x11] sm:$0xff]  ;;  %v265_v62 = vadd.f32 %v2250_v54, %v263_v57  ;;  %v264_v0 = vmul.f32 %v2251_v52, %v257_v60  ;;  %v289_v2 = vld [vmem:[#allocation2 + $0x3] sm:$0xff]  ;;  %v285_v6 = vmul.f32 %v2253_v58, %v278_v59  ;;  %v739_v57 = vsub.s32 4, %v694_v41 }
 0x1c6   :  { %v279_v4 = vld [vmem:[#allocation2 + $0x12] sm:$0xff]  ;;  %v275_v8 = vmul.f32 %v2252_v53, %v268_v61  ;;  %v296_v11 = vmul.f32 %v2254_v3, %v289_v2  ;;  %v717_v53 = vsub.s32 2, %v694_v41 }
 0x1c7   :  { %v276_v5 = vadd.f32 %v274_v63, %v265_v62  ;;  %v266_v7 = vadd.f32 %v2250_v54, %v264_v0  ;;  %v290_v9 = vld [vmem:[#allocation2 + $0x13] sm:$0xff]  ;;  %v286_v13 = vmul.f32 %v2253_v58, %v279_v4  ;;  %v750_v58 = vsub.s32 5, %v694_v41 }
 0x1c8   :  { %v297_v16 = vmul.f32 %v2254_v3, %v290_v9  ;;  %v761_v62 = vsub.s32 6, %v694_v41  ;;  %v772_v63 = vsub.s32 7, %v694_v41 }
 0x1c9   :  { %v287_v10 = vadd.f32 %v285_v6, %v276_v5  ;;  %v277_v12 = vadd.f32 %v275_v8, %v266_v7 }
 0x1cb   :  { %v298_v14 = vadd.f32 %v296_v11, %v287_v10  ;;  %v288_v15 = vadd.f32 %v286_v13, %v277_v12 }
 0x1cd   :  { %v300_v17 = vsub.f32 0.0, %v298_v14  ;;  %v299_v18 = vadd.f32 %v297_v16, %v288_v15 }
 0x1cf   :  { %v302_v19 = vmul.f32 1.442695, %v300_v17  ;;  %v301_v20 = vsub.f32 0.0, %v299_v18 }
 0x1d1   :  { %2527 = vpow2.f32 %v302_v19  ;;  %v304_v21 = vmul.f32 1.442695, %v301_v20 }
 0x1d3   :  { %2529 = vpow2.f32 %v304_v21 }
 0x1db   :  { %v2528_v22 = vpop.eup %2527 }
 0x1dc   :  { %v306_v23 = vadd.f32 1.0, %v2528_v22 }
 0x1dd   :  { %v2530_v24 = vpop.eup %2529 }
 0x1de   :  { %2531 = vrcp.f32 %v306_v23  ;;  %v307_v25 = vadd.f32 1.0, %v2530_v24 }
 0x1e0   :  { %2533 = vrcp.f32 %v307_v25 }
 0x1e8   :  { %v2532_v26 = vpop.eup %2531 }
 0x1e9   :  { %v2867_v29 = vmul.f32 %v2532_v26, %v298_v14 }
 0x1ea   :  { %v2534_v30 = vpop.eup %2533 }
 0x1eb   :  { %2394 = vmatprep.mubr.msk.f32.mxu1 %vm240_vm3, %v2867_v29  ;;  %2413 = vmatprep.mubr.msk.f32.mxu0 %vm240_vm3, %v2867_v29  ;;  %v2873_v31 = vmul.f32 %v2534_v30, %v299_v18 }
 0x1ed   :  { %2395 = vmatmul.mubr.msk.f32.vlgmr.msra.gmra.mrb[4].mxu1 %vm240_vm3, %v2873_v31  ;;  %2414 = vmatmul.mubr.msk.f32.vlgmr.msra.gmra.mrb[8].mxu0 %vm240_vm3, %v2873_v31 }
 0x1ee   :  { %2495 = vmatpush3.bf16.msra.mxu1 %v2837_v43  ;;  %2432 = vmatprep.mubr.msk.f32.mxu1 %vm240_vm3, %v2867_v29  ;;  %v706_v43 = vsub.s32 1, %v694_v41 }
 0x1ef   :  { %2497 = vmatprep.subr.bf16.mxu1 %v2496_v32  ;;  %2436 = vmatpush3.msk.msra.mxu0 %vm584_vm5, %v569_v39 }
 0x1f0   :  { %2440 = vmatprep.subr.bf16.mxu0 %v2643_v1 }
 0x1f2   :  { %2499 = vmatpush3.bf16.msra.mxu1 %v2496_v32 }
 0x1f3   :  { %2501 = vmatprep.subr.bf16.mxu1 %v2500_v35 }
 0x1f6   :  { %2503 = vmatpush3.bf16.msra.mxu1 %v2500_v35 }
 0x1f7   :  { %2505 = vmatprep.subr.bf16.mxu1 %v2504_v38 }
 0x1fa   :  { %2507 = vmatpush3.bf16.msra.mxu1 %v2504_v38 }
 0x1fb   :  { %2452 = vmatprep.subr.bf16.mxu1 %v2643_v1 }
 0x1fd   :  { %2433 = vmatmul.mubr.msk.f32.vlgmr.msra.gmra.mrb[6].mxu1 %vm240_vm3, %v2873_v31 }
 0x1fe   :  { %2456 = vmatprep.mubr.msk.bf16.mxu1 %vm2644_vm1, %v2643_v1 }
 0x2c0   :  { %v2396_v46 = vpop.f32.mrb[4].mxu1  ;;  %v2415_v47 = vpop.f32.mrb[8].mxu0 }
 0x2c1   :  { %v394_v48 = vpop.f32.mrb[5].mxu1  ;;  %v2903_v50 = vpop.f32.mrb[9].mxu0  ;;  %v795_v51 = vrot.slane %v2415_v47, %v706_v43  ;;  %v784_v52 = vrot.slane %v2415_v47, %v695_v44  ;;  %v806_v54 = vrot.slane %v2415_v47, %v717_v53  ;;  %v817_v56 = vrot.slane %v2415_v47, %v728_v55 }
 0x2c2   :  { %2437 = vmatprep.mubr.msk.f32.mxu0 %vm577_vm6, %v394_v48  ;;  %v828_v59 = vrot.slane %v2415_v47, %v739_v57  ;;  %v839_v61 = vrot.slane %v2415_v47, %v750_v58  ;;  %v850_v18 = vrot.slane %v2415_v47, %v761_v62  ;;  %v861_v19 = vrot.slane %v2415_v47, %v772_v63 }
 0x2c3   :  { %2438 = vmatmul.mubr.msk.f32.vlgmr.msra.gmra.mrb[10].mxu0 %vm577_vm6, %v2396_v46  ;;  %797 = vbcast.lane.b32.xlu0 %v795_v51, 256  ;;  %v696_v20 = vrot.slane %v2903_v50, %v695_v44  ;;  %v707_v21 = vrot.slane %v2903_v50, %v706_v43  ;;  %v718_v22 = vrot.slane %v2903_v50, %v717_v53 }
 0x2c4   :  { %786 = vbcast.lane.b32.xlu1 %v784_v52, 256  ;;  %2448 = vmatprep.mubr.msk.bf16.mxu0 %vm2644_vm1, %v2643_v1  ;;  %v729_v23 = vrot.slane %v2903_v50, %v728_v55  ;;  %v740_v24 = vrot.slane %v2903_v50, %v739_v57  ;;  %v751_v25 = vrot.slane %v2903_v50, %v750_v58  ;;  %vm2070_vm1 = vcmask 1047559  }
 0x2c5   :  { %v762_v26 = vrot.slane %v2903_v50, %v761_v62  ;;  %v773_v27 = vrot.slane %v2903_v50, %v772_v63 }
 0x2c7   :  { %808 = vbcast.lane.b32.xlu0 %v806_v54, 256 }
 0x2c8   :  { %790 = vbcast.lane.b32.xlu1 %v784_v52, 264 }
 0x2cb   :  { %819 = vbcast.lane.b32.xlu0 %v817_v56, 256 }
 0x2cc   :  { %801 = vbcast.lane.b32.xlu1 %v795_v51, 264 }
 0x2cf   :  { %830 = vbcast.lane.b32.xlu0 %v828_v59, 256 }
 0x2d0   :  { %v2434_v60 = vpop.f32.mrb[6].mxu1  ;;  %812 = vbcast.lane.b32.xlu1 %v806_v54, 264 }
 0x2d1   :  { %v560_v0 = vpop.f32.mrb[7].mxu1  ;;  %v1594_v2 = vrot.slane %v2434_v60, %v706_v43  ;;  %v1605_v3 = vrot.slane %v2434_v60, %v717_v53  ;;  %v1583_v4 = vrot.slane %v2434_v60, %v695_v44  ;;  %v1616_v5 = vrot.slane %v2434_v60, %v728_v55 }
 0x2d2   :  { %v1627_v6 = vrot.slane %v2434_v60, %v739_v57  ;;  %v1506_v7 = vrot.slane %v560_v0, %v706_v43  ;;  %v1517_v8 = vrot.slane %v560_v0, %v717_v53  ;;  %v1495_v9 = vrot.slane %v560_v0, %v695_v44 }
 0x2d3   :  { %841 = vbcast.lane.b32.xlu0 %v839_v61, 256  ;;  %v1528_v10 = vrot.slane %v560_v0, %v728_v55  ;;  %v1539_v11 = vrot.slane %v560_v0, %v739_v57  ;;  %v1550_v12 = vrot.slane %v560_v0, %v750_v58  ;;  %v2907_v13 = vrot.slane %v2434_v60, %v750_v58 }
 0x2d4   :  { %823 = vbcast.lane.b32.xlu1 %v817_v56, 264  ;;  %v2909_v14 = vrot.slane %v560_v0, %v761_v62  ;;  %v2911_v15 = vrot.slane %v2434_v60, %v761_v62  ;;  %v2913_v16 = vrot.slane %v560_v0, %v772_v63  ;;  %v2915_v17 = vrot.slane %v2434_v60, %v772_v63 }
 0x2d7   :  { %852 = vbcast.lane.b32.xlu0 %v850_v18, 256 }
 0x2d8   :  { %834 = vbcast.lane.b32.xlu1 %v828_v59, 264 }
 0x2db   :  { %863 = vbcast.lane.b32.xlu0 %v861_v19, 256 }
 0x2dc   :  { %845 = vbcast.lane.b32.xlu1 %v839_v61, 264 }
 0x2df   :  { %698 = vbcast.lane.b32.xlu0 %v696_v20, 256 }
 0x2e0   :  { %856 = vbcast.lane.b32.xlu1 %v850_v18, 264 }
 0x2e3   :  { %702 = vbcast.lane.b32.xlu0 %v696_v20, 264 }
 0x2e4   :  { %867 = vbcast.lane.b32.xlu1 %v861_v19, 264 }
 0x2e7   :  { %709 = vbcast.lane.b32.xlu0 %v707_v21, 256 }
 0x2e8   :  { %713 = vbcast.lane.b32.xlu1 %v707_v21, 264 }
 0x2eb   :  { %720 = vbcast.lane.b32.xlu0 %v718_v22, 256 }
 0x2ec   :  { %724 = vbcast.lane.b32.xlu1 %v718_v22, 264 }
 0x2ef   :  { %731 = vbcast.lane.b32.xlu0 %v729_v23, 256 }
 0x2f0   :  { %735 = vbcast.lane.b32.xlu1 %v729_v23, 264 }
 0x2f3   :  { %742 = vbcast.lane.b32.xlu0 %v740_v24, 256 }
 0x2f4   :  { %746 = vbcast.lane.b32.xlu1 %v740_v24, 264 }
 0x2f7   :  { %753 = vbcast.lane.b32.xlu0 %v751_v25, 256 }
 0x2f8   :  { %757 = vbcast.lane.b32.xlu1 %v751_v25, 264 }
 0x2fb   :  { %764 = vbcast.lane.b32.xlu0 %v762_v26, 256 }
 0x2fc   :  { %768 = vbcast.lane.b32.xlu1 %v762_v26, 264 }
 0x2ff   :  { %775 = vbcast.lane.b32.xlu0 %v773_v27, 256 }
 0x300   :  { %779 = vbcast.lane.b32.xlu1 %v773_v27, 264 }
 0x303   :  { %1600 = vbcast.lane.b32.xlu0 %v1594_v2, 264 }
 0x304   :  { %1596 = vbcast.lane.b32.xlu1 %v1594_v2, 256 }
 0x307   :  { %1611 = vbcast.lane.b32.xlu0 %v1605_v3, 264 }
 0x308   :  { %1607 = vbcast.lane.b32.xlu1 %v1605_v3, 256 }
 0x30b   :  { %1589 = vbcast.lane.b32.xlu0 %v1583_v4, 264 }
 0x30c   :  { %1585 = vbcast.lane.b32.xlu1 %v1583_v4, 256 }
 0x30f   :  { %1622 = vbcast.lane.b32.xlu0 %v1616_v5, 264 }
 0x310   :  { %1618 = vbcast.lane.b32.xlu1 %v1616_v5, 256 }
 0x313   :  { %1633 = vbcast.lane.b32.xlu0 %v1627_v6, 264 }
 0x314   :  { %1629 = vbcast.lane.b32.xlu1 %v1627_v6, 256 }
 0x317   :  { %1512 = vbcast.lane.b32.xlu0 %v1506_v7, 264 }
 0x318   :  { %1508 = vbcast.lane.b32.xlu1 %v1506_v7, 256 }
 0x31b   :  { %1523 = vbcast.lane.b32.xlu0 %v1517_v8, 264 }
 0x31c   :  { %1519 = vbcast.lane.b32.xlu1 %v1517_v8, 256 }
 0x31f   :  { %1501 = vbcast.lane.b32.xlu0 %v1495_v9, 264 }
 0x320   :  { %1497 = vbcast.lane.b32.xlu1 %v1495_v9, 256 }
 0x323   :  { %1534 = vbcast.lane.b32.xlu0 %v1528_v10, 264 }
 0x324   :  { %1530 = vbcast.lane.b32.xlu1 %v1528_v10, 256 }
 0x327   :  { %1545 = vbcast.lane.b32.xlu0 %v1539_v11, 264 }
 0x328   :  { %1541 = vbcast.lane.b32.xlu1 %v1539_v11, 256 }
 0x32b   :  { %1556 = vbcast.lane.b32.xlu0 %v1550_v12, 264 }
 0x32c   :  { %1552 = vbcast.lane.b32.xlu1 %v1550_v12, 256 }
 0x335   :  { %v798_v28 = vpop.permute.xlu0 %797 }
 0x336   :  { %888 = vst.msk [vmem:[#allocation5 + $0x90] sm:$0xff] %vm869_vm7, %v798_v28  ;;  %v787_v30 = vpop.permute.xlu1 %786 }
 0x337   :  { %886 = vst.msk [vmem:[#allocation5 + $0x80] sm:$0xff] %vm869_vm7, %v787_v30 }
 0x339   :  { %v809_v32 = vpop.permute.xlu0 %808 }
 0x33a   :  { %890 = vst.msk [vmem:[#allocation5 + $0xa0] sm:$0xff] %vm869_vm7, %v809_v32  ;;  %v791_v33 = vpop.permute.xlu1 %790 }
 0x33b   :  { %887 = vst.msk [vmem:[#allocation5 + $0x88] sm:$0xff] %vm869_vm7, %v791_v33 }
 0x33d   :  { %v820_v34 = vpop.permute.xlu0 %819  ;;  %v981_v39 = vld [vmem:[#allocation5 + $0x90] sm:$0xff] }
 0x33e   :  { %892 = vst.msk [vmem:[#allocation5 + $0xb0] sm:$0xff] %vm869_vm7, %v820_v34  ;;  %v802_v35 = vpop.permute.xlu1 %801  ;;  %v908_v36 = vld [vmem:[#allocation5 + $0x80] sm:$0xff] }
 0x33f   :  { %889 = vst.msk [vmem:[#allocation5 + $0x98] sm:$0xff] %vm869_vm7, %v802_v35  ;;  %946 = vperm.xlu1 %2514, %v908_v36  }
 0x341   :  { %v831_v37 = vpop.permute.xlu0 %830  ;;  %v1055_v43 = vld [vmem:[#allocation5 + $0xa0] sm:$0xff] }
 0x342   :  { %894 = vst.msk [vmem:[#allocation5 + $0xc0] sm:$0xff] %vm869_vm7, %v831_v37  ;;  %v813_v38 = vpop.permute.xlu1 %812  ;;  %v909_v40 = vld [vmem:[#allocation5 + $0x88] sm:$0xff] }
 0x343   :  { %891 = vst.msk [vmem:[#allocation5 + $0xa8] sm:$0xff] %vm869_vm7, %v813_v38  ;;  %1019 = vperm.xlu1 %2514, %v981_v39   ;;  %951 = vperm.xlu0 %2515, %v909_v40  }
 0x345   :  { %v842_v41 = vpop.permute.xlu0 %841  ;;  %v1129_v48 = vld [vmem:[#allocation5 + $0xb0] sm:$0xff] }
 0x346   :  { %896 = vst.msk [vmem:[#allocation5 + $0xd0] sm:$0xff] %vm869_vm7, %v842_v41  ;;  %v824_v42 = vpop.permute.xlu1 %823  ;;  %v982_v44 = vld [vmem:[#allocation5 + $0x98] sm:$0xff] }
 0x347   :  { %893 = vst.msk [vmem:[#allocation5 + $0xb8] sm:$0xff] %vm869_vm7, %v824_v42  ;;  %1093 = vperm.xlu1 %2514, %v1055_v43   ;;  %1024 = vperm.xlu0 %2515, %v982_v44  }
 0x349   :  { %v853_v46 = vpop.permute.xlu0 %852  ;;  %v1203_v53 = vld [vmem:[#allocation5 + $0xc0] sm:$0xff] }
 0x34a   :  { %898 = vst.msk [vmem:[#allocation5 + $0xe0] sm:$0xff] %vm869_vm7, %v853_v46  ;;  %v835_v47 = vpop.permute.xlu1 %834  ;;  %v1056_v50 = vld [vmem:[#allocation5 + $0xa8] sm:$0xff]  ;;  %v1933_v46 = vsub.f32 0.0, %v2840_v45 }
 0x34b   :  { %895 = vst.msk [vmem:[#allocation5 + $0xc8] sm:$0xff] %vm869_vm7, %v835_v47  ;;  %1167 = vperm.xlu1 %2514, %v1129_v48   ;;  %1098 = vperm.xlu0 %2515, %v1056_v50  }
 0x34c   :  { %v1935_v48 = vmul.f32 1.442695, %v1933_v46 }
 0x34d   :  { %v864_v51 = vpop.permute.xlu0 %863  ;;  %v1277_v57 = vld [vmem:[#allocation5 + $0xd0] sm:$0xff] }
 0x34e   :  { %900 = vst.msk [vmem:[#allocation5 + $0xf0] sm:$0xff] %vm869_vm7, %v864_v51  ;;  %v846_v52 = vpop.permute.xlu1 %845  ;;  %v1130_v54 = vld [vmem:[#allocation5 + $0xb8] sm:$0xff]  ;;  %2535 = vpow2.f32 %v1935_v48 }
 0x34f   :  { %897 = vst.msk [vmem:[#allocation5 + $0xd8] sm:$0xff] %vm869_vm7, %v846_v52  ;;  %1241 = vperm.xlu1 %2514, %v1203_v53   ;;  %1172 = vperm.xlu0 %2515, %v1130_v54  }
 0x351   :  { %v699_v55 = vpop.permute.xlu0 %698  ;;  %v1351_v61 = vld [vmem:[#allocation5 + $0xe0] sm:$0xff] }
 0x352   :  { %v857_v56 = vpop.permute.xlu1 %856  ;;  %870 = vst.msk [vmem:[#allocation5] sm:$0xff] %vm869_vm7, %v699_v55  ;;  %v1204_v58 = vld [vmem:[#allocation5 + $0xc8] sm:$0xff] }
 0x353   :  { %899 = vst.msk [vmem:[#allocation5 + $0xe8] sm:$0xff] %vm869_vm7, %v857_v56  ;;  %1315 = vperm.xlu1 %2514, %v1277_v57   ;;  %1246 = vperm.xlu0 %2515, %v1204_v58  }
 0x355   :  { %v703_v59 = vpop.permute.xlu0 %702  ;;  %v1425_v2 = vld [vmem:[#allocation5 + $0xf0] sm:$0xff] }
 0x356   :  { %v868_v60 = vpop.permute.xlu1 %867  ;;  %871 = vst.msk [vmem:[#allocation5 + $0x8] sm:$0xff] %vm869_vm7, %v703_v59  ;;  %v1278_v62 = vld [vmem:[#allocation5 + $0xd8] sm:$0xff] }
 0x357   :  { %901 = vst.msk [vmem:[#allocation5 + $0xf8] sm:$0xff] %vm869_vm7, %v868_v60  ;;  %1389 = vperm.xlu1 %2514, %v1351_v61   ;;  %1320 = vperm.xlu0 %2515, %v1278_v62  }
 0x358   :  { %v2536_v62 = vpop.eup %2535 }
 0x359   :  { %v710_v63 = vpop.permute.xlu0 %709  ;;  %v906_v11 = vld [vmem:[#allocation5] sm:$0xff] }
 0x35a   :  { %v714_v0 = vpop.permute.xlu1 %713  ;;  %872 = vst.msk [vmem:[#allocation5 + $0x10] sm:$0xff] %vm869_vm7, %v710_v63  ;;  %v1352_v3 = vld [vmem:[#allocation5 + $0xe8] sm:$0xff] }
 0x35b   :  { %873 = vst.msk [vmem:[#allocation5 + $0x18] sm:$0xff] %vm869_vm7, %v714_v0  ;;  %1463 = vperm.xlu1 %2514, %v1425_v2   ;;  %1394 = vperm.xlu0 %2515, %v1352_v3   ;;  %v1939_v2 = vadd.f32 1.0, %v2536_v62 }
 0x35d   :  { %v721_v4 = vpop.permute.xlu0 %720  ;;  %v907_v5 = vld [vmem:[#allocation5 + $0x8] sm:$0xff] }
 0x35e   :  { %v725_v6 = vpop.permute.xlu1 %724  ;;  %874 = vst.msk [vmem:[#allocation5 + $0x20] sm:$0xff] %vm869_vm7, %v721_v4  ;;  %v1426_v7 = vld [vmem:[#allocation5 + $0xf8] sm:$0xff] }
 0x35f   :  { %875 = vst.msk [vmem:[#allocation5 + $0x28] sm:$0xff] %vm869_vm7, %v725_v6  ;;  %1468 = vperm.xlu0 %2515, %v1426_v7   ;;  %941 = vperm.xlu1 %2514, %v907_v5   ;;  %v679_v6 = vld [vmem:[%s3480_s12] sm:$0xff] }
 0x361   :  { %v732_v8 = vpop.permute.xlu0 %731  ;;  %v979_v9 = vld [vmem:[#allocation5 + $0x10] sm:$0xff] }
 0x362   :  { %v736_v10 = vpop.permute.xlu1 %735  ;;  %876 = vst.msk [vmem:[#allocation5 + $0x30] sm:$0xff] %vm869_vm7, %v732_v8  ;;  %v980_v20 = vld [vmem:[#allocation5 + $0x18] sm:$0xff] }
 0x363   :  { %877 = vst.msk [vmem:[#allocation5 + $0x38] sm:$0xff] %vm869_vm7, %v736_v10  ;;  %936 = vperm.xlu0 %2515, %v906_v11   ;;  %1009 = vperm.xlu1 %2514, %v979_v9   ;;  %v680_v10 = vld [vmem:[%s3480_s12 + $0x8] sm:$0xff] }
 0x365   :  { %v743_v12 = vpop.permute.xlu0 %742  ;;  %v1053_v18 = vld [vmem:[#allocation5 + $0x20] sm:$0xff] }
 0x366   :  { %v747_v19 = vpop.permute.xlu1 %746  ;;  %878 = vst.msk [vmem:[#allocation5 + $0x40] sm:$0xff] %vm869_vm7, %v743_v12  ;;  %v1054_v24 = vld [vmem:[#allocation5 + $0x28] sm:$0xff]  ;;  %v681_v12 = vmul.f32 1.442695, %v679_v6 }
 0x367   :  { %879 = vst.msk [vmem:[#allocation5 + $0x48] sm:$0xff] %vm869_vm7, %v747_v19  ;;  %1014 = vperm.xlu0 %2515, %v980_v20   ;;  %1083 = vperm.xlu1 %2514, %v1053_v18   ;;  %v683_v18 = vmul.f32 1.442695, %v680_v10  ;;  %v2521_v20 = vld [vmem:[%s3482_s14] sm:$0xff]  }
 0x368   :  { %2441 = vmatpush3.bf16.msra.mxu0 %v2521_v20 }
 0x369   :  { %v754_v21 = vpop.permute.xlu0 %753  ;;  %v1127_v22 = vld [vmem:[#allocation5 + $0x30] sm:$0xff]  ;;  %2442 = vmatprep.subr.bf16.mxu0 %v2643_v1 }
 0x36a   :  { %v758_v23 = vpop.permute.xlu1 %757  ;;  %880 = vst.msk [vmem:[#allocation5 + $0x50] sm:$0xff] %vm869_vm7, %v754_v21  ;;  %v1128_v28 = vld [vmem:[#allocation5 + $0x38] sm:$0xff] }
 0x36b   :  { %881 = vst.msk [vmem:[#allocation5 + $0x58] sm:$0xff] %vm869_vm7, %v758_v23  ;;  %1088 = vperm.xlu0 %2515, %v1054_v24   ;;  %1157 = vperm.xlu1 %2514, %v1127_v22   ;;  %v2522_v22 = vld [vmem:[%s3482_s14 + $0x8] sm:$0xff]  }
 0x36c   :  { %2443 = vmatpush3.bf16.msra.mxu0 %v2522_v22 }
 0x36d   :  { %v765_v25 = vpop.permute.xlu0 %764  ;;  %v1201_v26 = vld [vmem:[#allocation5 + $0x40] sm:$0xff]  ;;  %2444 = vmatprep.subr.bf16.mxu0 %v2643_v1 }
 0x36e   :  { %v769_v27 = vpop.permute.xlu1 %768  ;;  %882 = vst.msk [vmem:[#allocation5 + $0x60] sm:$0xff] %vm869_vm7, %v765_v25  ;;  %v1202_v34 = vld [vmem:[#allocation5 + $0x48] sm:$0xff]  ;;  %v2523_v25 = vld [vmem:[%s3482_s14 + $0x10] sm:$0xff]  }
 0x36f   :  { %883 = vst.msk [vmem:[#allocation5 + $0x68] sm:$0xff] %vm869_vm7, %v769_v27  ;;  %1162 = vperm.xlu0 %2515, %v1128_v28   ;;  %1231 = vperm.xlu1 %2514, %v1201_v26  }
 0x370   :  { %2445 = vmatpush3.bf16.msra.mxu0 %v2523_v25 }
 0x371   :  { %v776_v30 = vpop.permute.xlu0 %775  ;;  %v1275_v32 = vld [vmem:[#allocation5 + $0x50] sm:$0xff]  ;;  %2446 = vmatprep.subr.bf16.mxu0 %v2643_v1 }
 0x372   :  { %v780_v33 = vpop.permute.xlu1 %779  ;;  %884 = vst.msk [vmem:[#allocation5 + $0x70] sm:$0xff] %vm869_vm7, %v776_v30  ;;  %v1276_v36 = vld [vmem:[#allocation5 + $0x58] sm:$0xff] }
 0x373   :  { %885 = vst.msk [vmem:[#allocation5 + $0x78] sm:$0xff] %vm869_vm7, %v780_v33  ;;  %1236 = vperm.xlu0 %2515, %v1202_v34   ;;  %1305 = vperm.xlu1 %2514, %v1275_v32   ;;  %v2297_v34 = vld [vmem:[%s3481_s13] ss:$0 sm:$0xff] }
 0x375   :  { %v1349_v35 = vld [vmem:[#allocation5 + $0x60] sm:$0xff]  ;;  %v2961_v40 = vpop.permute.xlu0 %1600 }
 0x376   :  { %v1350_v38 = vld [vmem:[#allocation5 + $0x68] sm:$0xff]  ;;  %v2957_v39 = vpop.permute.xlu1 %1596 }
 0x377   :  { %1310 = vperm.xlu0 %2515, %v1276_v36   ;;  %1379 = vperm.xlu1 %2514, %v1349_v35   ;;  %v2524_v36 = vld [vmem:[%s3482_s14 + $0x18] sm:$0xff]  }
 0x378   :  { %2447 = vmatpush3.bf16.msra.mxu0 %v2524_v36 }
 0x379   :  { %v1423_v37 = vld [vmem:[#allocation5 + $0x70] sm:$0xff]  ;;  %v2968_v43 = vpop.permute.xlu0 %1611 }
 0x37a   :  { %v1424_v41 = vld [vmem:[#allocation5 + $0x78] sm:$0xff]  ;;  %v2964_v42 = vpop.permute.xlu1 %1607 }
 0x37b   :  { %1384 = vperm.xlu0 %2515, %v1350_v38   ;;  %1453 = vperm.xlu1 %2514, %v1423_v37  }
 0x37e   :  { %v2970_v44 = vpop.permute.xlu1 %1585 }
 0x37f   :  { %1644 = vbcast.lane.b32.xlu0 %v2907_v13, 264  ;;  %1640 = vbcast.lane.b32.xlu1 %v2907_v13, 256  ;;  %v2974_v13 = vpop.permute.xlu0 %1589 }
 0x382   :  { %v2980_v47 = vpop.permute.xlu1 %1618 }
 0x383   :  { %1458 = vperm.xlu0 %2515, %v1424_v41   ;;  %1563 = vbcast.lane.b32.xlu1 %v2909_v14, 256  ;;  %v2983_v51 = vpop.permute.xlu0 %1622 }
 0x386   :  { %v2988_v52 = vpop.permute.xlu1 %1629 }
 0x387   :  { %1567 = vbcast.lane.b32.xlu0 %v2909_v14, 264  ;;  %1651 = vbcast.lane.b32.xlu1 %v2911_v15, 256  ;;  %v1934_v14 = vsub.f32 0.0, %v2843_v49  ;;  %v2990_v57 = vpop.permute.xlu0 %1633 }
 0x389   :  { %v1937_v50 = vmul.f32 1.442695, %v1934_v14 }
 0x38a   :  { %v2992_v59 = vpop.permute.xlu1 %1508 }
 0x38b   :  { %1655 = vbcast.lane.b32.xlu0 %v2911_v15, 264  ;;  %1574 = vbcast.lane.b32.xlu1 %v2913_v16, 256  ;;  %v2261_v15 = vld [vmem:[%s3479_s11] ss:$0 sm:$0xff]  ;;  %2537 = vpow2.f32 %v1937_v50  ;;  %v2994_v61 = vpop.permute.xlu0 %1512 }
 0x38e   :  { %v2996_v0 = vpop.permute.xlu1 %1519 }
 0x38f   :  { %1578 = vbcast.lane.b32.xlu0 %v2913_v16, 264  ;;  %1662 = vbcast.lane.b32.xlu1 %v2915_v17, 256  ;;  %v2998_v4 = vpop.permute.xlu0 %1523 }
 0x392   :  { %v3003_v8 = vpop.permute.xlu1 %1497 }
 0x393   :  { %1666 = vbcast.lane.b32.xlu0 %v2915_v17, 264  ;;  %v3008_v19 = vpop.permute.xlu0 %1501 }
 0x395   :  { %v2538_v63 = vpop.eup %2537 }
 0x396   :  { %v2439_v53 = vpop.f32.mrb[10].mxu0  ;;  %v1940_v3 = vadd.f32 1.0, %v2538_v63  ;;  %v3013_v21 = vpop.permute.xlu1 %1530 }
 0x397   :  { %v660_v16 = vadd.f32 %v2439_v53, %v2261_v15  ;;  %v654_v54 = vpop.f32.mrb[11].mxu0  ;;  %v3019_v24 = vpop.permute.xlu0 %1534 }
 0x398   :  { %v655_v55 = vadd.f32 %v2261_v15, %v654_v54  ;;  %v3046_v15 = vmul.f32 %v2297_v34, %v2867_v29 }
 0x399   :  { %v666_v56 = vmin.f32 %v660_v16, 20.0  ;;  %vm664_vm8 = vcmp.gt.f32.partialorder %v660_v16, 20.0 }
 0x39a   :  { %v665_v58 = vmin.f32 %v655_v55, 20.0  ;;  %v3025_v28 = vpop.permute.xlu1 %1541  ;;  %vm663_vm9 = vcmp.gt.f32.partialorder %v655_v55, 20.0  ;;  %3503 = vst [vmem:[#allocation14_spill] sm:$0xff] %v3046_v15 }
 0x39b   :  { %v669_v17 = vmul.f32 1.442695, %v666_v56  ;;  %3499 = vst [vmem:[#allocation10_spill] sm:$0xff] %v3025_v28  ;;  %v3042_v14 = vpop.permute.xlu0 %1545 }
 0x39c   :  { %v667_v60 = vmul.f32 1.442695, %v665_v58  ;;  %3502 = vst [vmem:[#allocation13_spill] sm:$0xff] %v3042_v14 }
 0x39d   :  { %2539 = vpow2.f32 %v669_v17  ;;  %v2525_v17 = vld [vmem:[%s3483_s15] sm:$0xff]  }
 0x39e   :  { %2541 = vpow2.f32 %v667_v60  ;;  %2453 = vmatpush3.bf16.msra.mxu1 %v2525_v17 }
 0x39f   :  { %2543 = vrcp.f32 %v1939_v2  ;;  %2454 = vmatprep.subr.bf16.mxu1 %v2643_v1 }
 0x3a0   :  { %2545 = vrcp.f32 %v1940_v3 }
 0x3a7   :  { %v2540_v5 = vpop.eup %2539 }
 0x3a8   :  { %v2542_v7 = vpop.eup %2541  ;;  %v672_v9 = vadd.f32 1.0, %v2540_v5 }
 0x3a9   :  { %v671_v11 = vadd.f32 1.0, %v2542_v7  ;;  %v2544_v23 = vpop.eup %2543  ;;  %v3073_v7 = vmul.f32 %v2297_v34, %v2873_v31 }
 0x3aa   :  { %2547 = vlog2.f32 %v672_v9  ;;  %v2546_v26 = vpop.eup %2545  ;;  %v3028_v32 = vmul.f32 %v2544_v23, %v2840_v45 }
 0x3ab   :  { %2549 = vlog2.f32 %v671_v11  ;;  %v3037_v37 = vmul.f32 %v2546_v26, %v2843_v49  ;;  %3505 = vst [vmem:[#allocation16_spill] sm:$0xff] %v3073_v7 }
 0x3ac   :  { %2551 = vpow2.f32 %v681_v12  ;;  %3500 = vst [vmem:[#allocation11_spill] sm:$0xff] %v3028_v32  ;;  %v3079_v12 = vpop.permute.xlu0 %1556 }
 0x3ad   :  { %2553 = vpow2.f32 %v683_v18  ;;  %3501 = vst [vmem:[#allocation12_spill] sm:$0xff] %v3037_v37  ;;  %3506 = vst [vmem:[#allocation17_spill] sm:$0xff] %v3079_v12 }
 0x3b4   :  { %v2548_v27 = vpop.eup %2547 }
 0x3b5   :  { %v2550_v30 = vpop.eup %2549  ;;  %v676_v33 = vmul.f32 0.6931472, %v2548_v27 }
 0x3b6   :  { %v674_v35 = vmul.f32 0.6931472, %v2550_v30  ;;  %v2552_v45 = vpop.eup %2551 }
 0x3b7   :  { %v678_v38 = vsel %vm664_vm8, %v660_v16, %v676_v33  ;;  %v2554_v48 = vpop.eup %2553  ;;  %v3052_v16 = vpop.permute.xlu1 %1552  ;;  %v3066_v2 = vsub.f32 0.0, %v2552_v45 }
 0x3b8   :  { %688 = vst.msk [vmem:[#allocation3 + $0x8] sm:$0xff] %vm240_vm3, %v678_v38  ;;  %v690_v41 = vmul.f32 %v678_v38, %v2873_v31  ;;  %v677_v46 = vsel %vm663_vm9, %v655_v55, %v674_v35  ;;  %3504 = vst [vmem:[#allocation15_spill] sm:$0xff] %v3052_v16  ;;  %v3068_v3 = vsub.f32 0.0, %v2554_v48 }
 0x3b9   :  { %687 = vst.msk [vmem:[#allocation3] sm:$0xff] %vm240_vm3, %v677_v46  ;;  %v689_v49 = vmul.f32 %v677_v46, %v2867_v29 }
 0x3ba   :  { %692 = vst.msk [vmem:[#allocation4 + $0x8] sm:$0xff] %vm240_vm3, %v690_v41 }
 0x3bb   :  { %691 = vst.msk [vmem:[#allocation4] sm:$0xff] %vm240_vm3, %v689_v49 }
 0x3be   :  { %v947_v18 = vpop.permute.xlu1 %946 }
 0x3bf   :  { %v2266_v25 = vld [vmem:[#allocation3 + $0x8] ss:$0 sm:$0xff]  ;;  %v2270_v26 = vld [vmem:[#allocation3 + $0x9] ss:$0 sm:$0xff]  ;;  %v2274_v27 = vld [vmem:[#allocation3 + $0xa] ss:$0 sm:$0xff] }
 0x3c0   :  { %v920_v30 = vmul.f32 %v2266_v25, %v3066_v2  ;;  %v993_v33 = vmul.f32 %v2270_v26, %v3066_v2  ;;  %v921_v1 = vmul.f32 %v2266_v25, %v3068_v3  ;;  %v2278_v34 = vld [vmem:[#allocation3 + $0xb] ss:$0 sm:$0xff]  ;;  %v1067_v36 = vmul.f32 %v2274_v27, %v3066_v2  ;;  %v2282_v10 = vld [vmem:[#allocation3 + $0xc] ss:$0 sm:$0xff]  ;;  %v2286_v54 = vld [vmem:[#allocation3 + $0xd] ss:$0 sm:$0xff] }
 0x3c1   :  { %v994_v11 = vmul.f32 %v2270_v26, %v3068_v3  ;;  %v2268_v6 = vld [vmem:[#allocation4 + $0x8] ss:$0 sm:$0xff]  ;;  %v1141_v25 = vmul.f32 %v2278_v34, %v3066_v2  ;;  %v2272_v58 = vld [vmem:[#allocation4 + $0x9] ss:$0 sm:$0xff]  ;;  %v1142_v26 = vmul.f32 %v2278_v34, %v3068_v3  ;;  %v2290_v50 = vld [vmem:[#allocation3 + $0xe] ss:$0 sm:$0xff]  ;;  %v1216_v20 = vmul.f32 %v2282_v10, %v3068_v3 }
 0x3c2   :  { %v926_v46 = vmul.f32 1.442695, %v920_v30  ;;  %v1020_v48 = vpop.permute.xlu1 %1019  ;;  %v952_v49 = vpop.permute.xlu0 %951  ;;  %v928_v17 = vmul.f32 1.442695, %v921_v1  ;;  %v999_v56 = vmul.f32 1.442695, %v993_v33  ;;  %v1068_v30 = vmul.f32 %v2274_v27, %v3068_v3 }
 0x3c3   :  { %v1073_v55 = vmul.f32 1.442695, %v1067_v36  ;;  %v1215_v1 = vmul.f32 %v2282_v10, %v3066_v2  ;;  %v964_v35 = vmul.f32 %v2268_v6, %v947_v18  ;;  %v1001_v62 = vmul.f32 1.442695, %v994_v11  ;;  %v2294_v31 = vld [vmem:[#allocation3 + $0xf] ss:$0 sm:$0xff] }
 0x3c4   :  { %2555 = vpow2.f32 %v926_v46  ;;  %v3103_v63 = vmul.f32 %v2272_v58, %v1020_v48  ;;  %v3105_v33 = vmul.f32 %v2268_v6, %v952_v49  ;;  %v1147_v27 = vmul.f32 1.442695, %v1141_v25  ;;  %v2276_v41 = vld [vmem:[#allocation4 + $0xa] ss:$0 sm:$0xff]  ;;  %v2273_v45 = vld [vmem:[#allocation3 + $0x2] ss:$0 sm:$0xff] }
 0x3c5   :  { %2557 = vpow2.f32 %v928_v17  ;;  %v1289_v36 = vmul.f32 %v2286_v54, %v3066_v2  ;;  %v1075_v34 = vmul.f32 1.442695, %v1068_v30  ;;  %v1363_v18 = vmul.f32 %v2290_v50, %v3066_v2  ;;  %v2265_v17 = vld [vmem:[#allocation3] ss:$0 sm:$0xff]  ;;  %v2269_v30 = vld [vmem:[#allocation3 + $0x1] ss:$0 sm:$0xff] }
 0x3c6   :  { %v1094_v5 = vpop.permute.xlu1 %1093  ;;  %v1025_v29 = vpop.permute.xlu0 %1024  ;;  %2559 = vpow2.f32 %v999_v56  ;;  %v1221_v11 = vmul.f32 1.442695, %v1215_v1  ;;  %v1149_v23 = vmul.f32 1.442695, %v1142_v26  ;;  %v1290_v48 = vmul.f32 %v2286_v54, %v3068_v3 }
 0x3c7   :  { %2561 = vpow2.f32 %v1073_v55  ;;  %v3111_v46 = vmul.f32 %v2276_v41, %v1094_v5  ;;  %v3113_v6 = vmul.f32 %v2272_v58, %v1025_v29  ;;  %v1437_v56 = vmul.f32 %v2294_v31, %v3066_v2  ;;  %v2280_v5 = vld [vmem:[#allocation4 + $0xb] ss:$0 sm:$0xff] }
 0x3c8   :  { %2563 = vpow2.f32 %v1001_v62  ;;  %v1295_v10 = vmul.f32 1.442695, %v1289_v36  ;;  %v1364_v22 = vmul.f32 %v2290_v50, %v3068_v3  ;;  %v919_v55 = vmul.f32 %v2265_v17, %v3068_v3 }
 0x3c9   :  { %2565 = vpow2.f32 %v1147_v27  ;;  %v1223_v1 = vmul.f32 1.442695, %v1216_v20  ;;  %v1369_v26 = vmul.f32 1.442695, %v1363_v18  ;;  %v1438_v54 = vmul.f32 %v2294_v31, %v3068_v3 }
 0x3ca   :  { %v1168_v49 = vpop.permute.xlu1 %1167  ;;  %v1099_v25 = vpop.permute.xlu0 %1098  ;;  %2567 = vpow2.f32 %v1075_v34  ;;  %v1297_v58 = vmul.f32 1.442695, %v1290_v48  ;;  %v918_v29 = vmul.f32 %v2265_v17, %v3066_v2  ;;  %v991_v62 = vmul.f32 %v2269_v30, %v3066_v2  ;;  %v2277_v34 = vld [vmem:[#allocation3 + $0x3] ss:$0 sm:$0xff] }
 0x3cb   :  { %2569 = vpow2.f32 %v1221_v11  ;;  %v3121_v27 = vmul.f32 %v2280_v5, %v1168_v49  ;;  %v3123_v36 = vmul.f32 %v2276_v41, %v1099_v25  ;;  %v1443_v20 = vmul.f32 1.442695, %v1437_v56 }
 0x3cc   :  { %2571 = vpow2.f32 %v1149_v23  ;;  %v1371_v31 = vmul.f32 1.442695, %v1364_v22  ;;  %v924_v11 = vmul.f32 1.442695, %v919_v55  ;;  %v3125_v17 = vmul.f32 1.442695, %v1438_v54 }
 0x3cd   :  { %2573 = vpow2.f32 %v1295_v10  ;;  %v1065_v60 = vmul.f32 %v2273_v45, %v3066_v2  ;;  %v992_v49 = vmul.f32 %v2269_v30, %v3068_v3  ;;  %v922_v25 = vmul.f32 1.442695, %v918_v29  ;;  %v2284_v23 = vld [vmem:[#allocation4 + $0xc] ss:$0 sm:$0xff]  ;;  %v2281_v55 = vld [vmem:[#allocation3 + $0x4] ss:$0 sm:$0xff] }
 0x3ce   :  { %v2556_v53 = vpop.eup %2555  ;;  %v1242_v50 = vpop.permute.xlu1 %1241  ;;  %2575 = vpow2.f32 %v1223_v1  ;;  %v1139_v22 = vmul.f32 %v2277_v34, %v3066_v2  ;;  %v1066_v10 = vmul.f32 %v2273_v45, %v3068_v3  ;;  %v2285_v54 = vld [vmem:[#allocation3 + $0x5] ss:$0 sm:$0xff] }
 0x3cf   :  { %v1173_v9 = vpop.permute.xlu0 %1172  ;;  %v932_v18 = vmul.f32 0.0, %v2556_v53  ;;  %v2558_v48 = vpop.eup %2557  ;;  %2577 = vpow2.f32 %v1369_v26  ;;  %v3129_v53 = vmul.f32 1.442695, %v991_v62  ;;  %v3135_v26 = vmul.f32 %v2284_v23, %v1242_v50 }
 0x3d0   :  { %v933_v41 = vmul.f32 0.0, %v2558_v48  ;;  %v2560_v32 = vpop.eup %2559  ;;  %2579 = vpow2.f32 %v1297_v58  ;;  %v3139_v58 = vmul.f32 1.442695, %v1065_v60  ;;  %v997_v62 = vmul.f32 1.442695, %v992_v49 }
 0x3d1   :  { %v968_v38 = vadd.f32 %v964_v35, %v932_v18  ;;  %v2562_v1 = vpop.eup %2561  ;;  %2581 = vpow2.f32 %v1443_v20  ;;  %v3137_v18 = vmul.f32 %v2280_v5, %v1173_v9  ;;  %v3145_v9 = vmul.f32 1.442695, %v1139_v22 }
 0x3d2   :  { %v1316_v56 = vpop.permute.xlu1 %1315  ;;  %v969_v35 = vadd.f32 %v3105_v33, %v933_v41  ;;  %v2564_v29 = vpop.eup %2563  ;;  %2583 = vpow2.f32 %v924_v11  ;;  %v2289_v33 = vld [vmem:[#allocation3 + $0x6] ss:$0 sm:$0xff]  ;;  %v3147_v60 = vmul.f32 1.442695, %v1066_v10  ;;  %v1287_v5 = vmul.f32 %v2285_v54, %v3066_v2 }
 0x3d3   :  { %v1247_v15 = vpop.permute.xlu0 %1246  ;;  %972 = vst.msk [vmem:[#allocation6 + $0x80] sm:$0xff] %vm240_vm3, %v968_v38  ;;  %v1005_v30 = vmul.f32 %v2560_v32, %v968_v38  ;;  %v2566_v48 = vpop.eup %2565  ;;  %v1213_v32 = vmul.f32 %v2281_v55, %v3066_v2  ;;  %v1140_v38 = vmul.f32 %v2277_v34, %v3068_v3  ;;  %2585 = vpow2.f32 %v1371_v31 }
 0x3d4   :  { %973 = vst.msk [vmem:[#allocation6 + $0x88] sm:$0xff] %vm240_vm3, %v969_v35  ;;  %v1006_v37 = vmul.f32 %v2564_v29, %v969_v35  ;;  %v2568_v50 = vpop.eup %2567  ;;  %2587 = vpow2.f32 %v922_v25  ;;  %v1214_v34 = vmul.f32 %v2281_v55, %v3068_v3  ;;  %v2293_v35 = vld [vmem:[#allocation3 + $0x7] ss:$0 sm:$0xff]  ;;  %v3155_v31 = vmul.f32 %v2284_v23, %v1247_v15 }
 0x3d5   :  { %v1041_v45 = vadd.f32 %v3103_v63, %v1005_v30  ;;  %v2570_v11 = vpop.eup %2569  ;;  %v2288_v30 = vld [vmem:[#allocation4 + $0xd] ss:$0 sm:$0xff]  ;;  %v1361_v22 = vmul.f32 %v2289_v33, %v3066_v2  ;;  %v1288_v10 = vmul.f32 %v2285_v54, %v3068_v3  ;;  %v3163_v25 = vmul.f32 1.442695, %v1213_v32 }
 0x3d6   :  { %v1390_v20 = vpop.permute.xlu1 %1389  ;;  %v1042_v49 = vadd.f32 %v3113_v6, %v1006_v37  ;;  %v2572_v29 = vpop.eup %2571  ;;  %v3153_v7 = vmul.f32 %v2288_v30, %v1316_v56  ;;  %v2292_v6 = vld [vmem:[#allocation4 + $0xe] ss:$0 sm:$0xff]  ;;  %v3165_v55 = vmul.f32 1.442695, %v1140_v38  ;;  %2589 = vpow2.f32 %v3125_v17 }
 0x3d7   :  { %v1321_v41 = vpop.permute.xlu0 %1320  ;;  %1046 = vst.msk [vmem:[#allocation6 + $0x90] sm:$0xff] %vm240_vm3, %v1041_v45  ;;  %v1079_v63 = vmul.f32 %v2562_v1, %v1041_v45  ;;  %v3159_v12 = vpop.eup %2573  ;;  %v3167_v15 = vmul.f32 %v2292_v6, %v1390_v20  ;;  %v3170_v54 = vmul.f32 1.442695, %v1287_v5  ;;  %2591 = vpow2.f32 %v3129_v53 }
 0x3d8   :  { %1047 = vst.msk [vmem:[#allocation6 + $0x98] sm:$0xff] %vm240_vm3, %v1042_v49  ;;  %v1080_v37 = vmul.f32 %v2568_v50, %v1042_v49  ;;  %v2576_v56 = vpop.eup %2575  ;;  %v3178_v49 = vmul.f32 1.442695, %v1214_v34  ;;  %v3180_v28 = vmul.f32 %v2288_v30, %v1321_v41  ;;  %v3183_v17 = vmul.f32 1.442695, %v1361_v22 }
 0x3d9   :  { %v1115_v1 = vadd.f32 %v3111_v46, %v1079_v63  ;;  %v1435_v46 = vmul.f32 %v2293_v35, %v3066_v2  ;;  %v3173_v63 = vpop.eup %2577  ;;  %v3185_v2 = vmul.f32 1.442695, %v1288_v10  ;;  %2593 = vpow2.f32 %v997_v62 }
 0x3da   :  { %v1684_v45 = vld [vmem:[#allocation6 + $0x80] sm:$0xff]  ;;  %v1464_v23 = vpop.permute.xlu1 %1463  ;;  %v1116_v38 = vadd.f32 %v3123_v36, %v1080_v37  ;;  %v2580_v20 = vpop.eup %2579  ;;  %2595 = vpow2.f32 %v3139_v58  ;;  %v1362_v22 = vmul.f32 %v2289_v33, %v3068_v3  ;;  %v1436_v10 = vmul.f32 %v2293_v35, %v3068_v3  ;;  %v2267_v37 = vld [vmem:[#allocation4] ss:$0 sm:$0xff] }
 0x3db   :  { %v1395_v16 = vpop.permute.xlu0 %1394  ;;  %v1716_v50 = vmul.f32 %v1684_v45, %v2970_v44  ;;  %1120 = vst.msk [vmem:[#allocation6 + $0xa0] sm:$0xff] %vm240_vm3, %v1115_v1  ;;  %v1153_v32 = vmul.f32 %v2566_v48, %v1115_v1  ;;  %v1685_v14 = vld [vmem:[#allocation6 + $0x88] sm:$0xff]  ;;  %v3187_v5 = vpop.eup %2581  ;;  %v3193_v53 = vmul.f32 1.442695, %v1435_v46  ;;  %2597 = vpow2.f32 %v3147_v60 }
 0x3dc   :  { %v1717_v44 = vmul.f32 %v1685_v14, %v2974_v13  ;;  %1121 = vst.msk [vmem:[#allocation6 + $0xa8] sm:$0xff] %vm240_vm3, %v1116_v38  ;;  %v1154_v36 = vmul.f32 %v2572_v29, %v1116_v38  ;;  %v2584_v34 = vpop.eup %2583  ;;  %v2296_v29 = vld [vmem:[#allocation4 + $0xf] ss:$0 sm:$0xff]  ;;  %2599 = vpow2.f32 %v3145_v9 }
 0x3dd   :  { %v1189_v48 = vadd.f32 %v3121_v27, %v1153_v32  ;;  %v1804_v13 = vsel %vm240_vm3, %v1716_v50, 0.0  ;;  %v2586_v45 = vpop.eup %2585  ;;  %v3202_v32 = vmul.f32 %v2296_v29, %v1464_v23  ;;  %v931_v33 = vmul.f32 0.0, %v2584_v34 }
 0x3de   :  { %v1686_v1 = vld [vmem:[#allocation6 + $0x90] sm:$0xff]  ;;  %v942_v41 = vpop.permute.xlu1 %941  ;;  %v1805_v14 = vsel %vm240_vm3, %v1717_v44, 0.0  ;;  %v1190_v62 = vadd.f32 %v3137_v18, %v1154_v36  ;;  %v2588_v3 = vpop.eup %2587  ;;  %v3214_v34 = vmul.f32 1.442695, %v1436_v10  ;;  %2601 = vpow2.f32 %v3165_v55 }
 0x3df   :  { %v1469_v30 = vpop.permute.xlu0 %1468  ;;  %1194 = vst.msk [vmem:[#allocation6 + $0xb0] sm:$0xff] %vm240_vm3, %v1189_v48  ;;  %v1227_v27 = vmul.f32 %v2570_v11, %v1189_v48  ;;  %v1718_v58 = vmul.f32 %v1686_v1, %v2957_v39  ;;  %v1687_v46 = vld [vmem:[#allocation6 + $0x98] sm:$0xff]  ;;  %v963_v38 = vmul.f32 %v2267_v37, %v942_v41  ;;  %v1806_v18 = vadd.f32 %v1805_v14, %v1804_v13 }
 0x3e0   :  { %v1719_v35 = vmul.f32 %v1687_v46, %v2961_v40  ;;  %1195 = vst.msk [vmem:[#allocation6 + $0xb8] sm:$0xff] %vm240_vm3, %v1190_v62  ;;  %v1228_v11 = vmul.f32 %v2576_v56, %v1190_v62  ;;  %v1408_v48 = vmul.f32 %v2292_v6, %v1395_v16  ;;  %v3216_v56 = vpop.eup %2589  ;;  %v930_v9 = vmul.f32 0.0, %v2588_v3 }
 0x3e1   :  { %v1263_v50 = vadd.f32 %v3135_v26, %v1227_v27  ;;  %v967_v36 = vadd.f32 %v963_v38, %v931_v33  ;;  %v3212_v26 = vmul.f32 1.442695, %v1362_v22  ;;  %v1813_v60 = vsel %vm240_vm3, %v1718_v58, 0.0  ;;  %v2592_v22 = vpop.eup %2591 }
 0x3e2   :  { %v1688_v44 = vld [vmem:[#allocation6 + $0xa0] sm:$0xff]  ;;  %v1010_v39 = vpop.permute.xlu1 %1009  ;;  %v1264_v40 = vadd.f32 %v3155_v31, %v1228_v11  ;;  %v1814_v16 = vsel %vm240_vm3, %v1719_v35, 0.0  ;;  %v3225_v10 = vmul.f32 %v2296_v29, %v1469_v30  ;;  %2603 = vpow2.f32 %v3163_v25 }
 0x3e3   :  { %v937_v1 = vpop.permute.xlu0 %936  ;;  %1268 = vst.msk [vmem:[#allocation6 + $0xc0] sm:$0xff] %vm240_vm3, %v1263_v50  ;;  %v1301_v23 = vmul.f32 %v3159_v12, %v1263_v50  ;;  %v1689_v6 = vld [vmem:[#allocation6 + $0xa8] sm:$0xff]  ;;  %971 = vst.msk [vmem:[#allocation6 + $0x8] sm:$0xff] %vm240_vm3, %v967_v36  ;;  %v1720_v13 = vmul.f32 %v1688_v44, %v2964_v42  ;;  %v1807_v58 = vrot.slane %v1806_v18, 4  ;;  %v2594_v46 = vpop.eup %2593  ;;  %2605 = vpow2.f32 %v3178_v49 }
 0x3e4   :  { %v962_v41 = vmul.f32 %v2267_v37, %v937_v1  ;;  %1269 = vst.msk [vmem:[#allocation6 + $0xc8] sm:$0xff] %vm240_vm3, %v1264_v40  ;;  %v1302_v31 = vmul.f32 %v2580_v20, %v1264_v40  ;;  %v3228_v37 = vadd.f32 %v1814_v16, %v1813_v60  ;;  %v1721_v42 = vmul.f32 %v1689_v6, %v2968_v43  ;;  %v2271_v20 = vld [vmem:[#allocation4 + $0x1] ss:$0 sm:$0xff]  ;;  %v2596_v30 = vpop.eup %2595  ;;  %v2275_v60 = vld [vmem:[#allocation4 + $0x2] ss:$0 sm:$0xff] }
 0x3e5   :  { %v1337_v12 = vadd.f32 %v3153_v7, %v1301_v23  ;;  %v1035_v33 = vmul.f32 %v2271_v20, %v1010_v39  ;;  %v1004_v25 = vmul.f32 %v2594_v46, %v967_v36  ;;  %v3236_v35 = vsel %vm240_vm3, %v1720_v13, 0.0  ;;  %v2598_v36 = vpop.eup %2597 }
 0x3e6   :  { %v966_v14 = vadd.f32 %v962_v41, %v930_v9  ;;  %v1084_v27 = vpop.permute.xlu1 %1083  ;;  %v1338_v55 = vadd.f32 %v3180_v28, %v1302_v31  ;;  %v1690_v29 = vld [vmem:[#allocation6 + $0xb0] sm:$0xff]  ;;  %2607 = vpow2.f32 %v3170_v54  ;;  %v3242_v1 = vadd.f32 %v1807_v58, %v1806_v18  ;;  %v2600_v16 = vpop.eup %2599 }
 0x3e7   :  { %v1015_v62 = vpop.permute.xlu0 %1014  ;;  %1342 = vst.msk [vmem:[#allocation6 + $0xd0] sm:$0xff] %vm240_vm3, %v1337_v12  ;;  %v1375_v7 = vmul.f32 %v3173_v63, %v1337_v12  ;;  %v1691_v28 = vld [vmem:[#allocation6 + $0xb8] sm:$0xff]  ;;  %v3245_v23 = vmul.f32 %v1690_v29, %v2980_v47  ;;  %v1109_v18 = vmul.f32 %v2275_v60, %v1084_v27  ;;  %2609 = vpow2.f32 %v3185_v2 }
 0x3e8   :  { %970 = vst.msk [vmem:[#allocation6] sm:$0xff] %vm240_vm3, %v966_v14  ;;  %v1003_v38 = vmul.f32 %v2592_v22, %v966_v14  ;;  %v1036_v3 = vmul.f32 %v2271_v20, %v1015_v62  ;;  %1343 = vst.msk [vmem:[#allocation6 + $0xd8] sm:$0xff] %vm240_vm3, %v1338_v55  ;;  %v1376_v50 = vmul.f32 %v2586_v45, %v1338_v55  ;;  %v2279_v22 = vld [vmem:[#allocation4 + $0x3] ss:$0 sm:$0xff]  ;;  %2611 = vpow2.f32 %v3183_v17 }
 0x3e9   :  { %v1411_v43 = vadd.f32 %v3167_v15, %v1375_v7  ;;  %v3248_v15 = vsel %vm240_vm3, %v1721_v42, 0.0  ;;  %v3255_v9 = vmul.f32 %v1691_v28, %v2983_v51  ;;  %v2602_v51 = vpop.eup %2601  ;;  %v1809_v2 = vrot.slane %v3242_v1, 2 }
 0x3ea   :  { %v1039_v63 = vadd.f32 %v1035_v33, %v1003_v38  ;;  %v1040_v11 = vadd.f32 %v1036_v3, %v1004_v25  ;;  %v1158_v44 = vpop.permute.xlu1 %1157  ;;  %v1412_v45 = vadd.f32 %v1408_v48, %v1376_v50  ;;  %v1669_v40 = vld [vmem:[#allocation6 + $0x8] sm:$0xff]  ;;  %v1692_v48 = vld [vmem:[#allocation6 + $0xc0] sm:$0xff]  ;;  %2613 = vpow2.f32 %v3193_v53  ;;  %v2283_v33 = vld [vmem:[#allocation4 + $0x4] ss:$0 sm:$0xff] }
 0x3eb   :  { %v1089_v39 = vpop.permute.xlu0 %1088  ;;  %1416 = vst.msk [vmem:[#allocation6 + $0xe0] sm:$0xff] %vm240_vm3, %v1411_v43  ;;  %v1449_v49 = vmul.f32 %v3187_v5, %v1411_v43  ;;  %v1693_v13 = vld [vmem:[#allocation6 + $0xc8] sm:$0xff]  ;;  %v1701_v12 = vmul.f32 %v1669_v40, %v3008_v19  ;;  %v3271_v17 = vmul.f32 %v1692_v48, %v2988_v52  ;;  %2615 = vpow2.f32 %v3212_v26 }
 0x3ec   :  { %1044 = vst.msk [vmem:[#allocation6 + $0x10] sm:$0xff] %vm240_vm3, %v1039_v63  ;;  %v1077_v54 = vmul.f32 %v2596_v30, %v1039_v63  ;;  %1045 = vst.msk [vmem:[#allocation6 + $0x18] sm:$0xff] %vm240_vm3, %v1040_v11  ;;  %v1078_v6 = vmul.f32 %v2598_v36, %v1040_v11  ;;  %v1110_v47 = vmul.f32 %v2275_v60, %v1089_v39  ;;  %v2604_v42 = vpop.eup %2603  ;;  %2617 = vpow2.f32 %v3214_v34  ;;  %v2287_v60 = vld [vmem:[#allocation4 + $0x5] ss:$0 sm:$0xff] }
 0x3ed   :  { %v1485_v41 = vadd.f32 %v3202_v32, %v1449_v49  ;;  %1417 = vst.msk [vmem:[#allocation6 + $0xe8] sm:$0xff] %vm240_vm3, %v1412_v45  ;;  %v1450_v5 = vmul.f32 %v3216_v56, %v1412_v45  ;;  %v1183_v56 = vmul.f32 %v2279_v22, %v1158_v44  ;;  %v1733_v20 = vsel %vm240_vm3, %v1701_v12, 0.0  ;;  %v2606_v52 = vpop.eup %2605 }
 0x3ee   :  { %v1113_v31 = vadd.f32 %v1109_v18, %v1077_v54  ;;  %v1114_v14 = vadd.f32 %v1110_v47, %v1078_v6  ;;  %v1232_v27 = vpop.permute.xlu1 %1231  ;;  %v3287_v49 = vadd.f32 %v1809_v2, %v3242_v1  ;;  %v3292_v34 = vadd.f32 %v3248_v15, %v3236_v35 }
 0x3ef   :  { %v1163_v62 = vpop.permute.xlu0 %1162  ;;  %1490 = vst.msk [vmem:[#allocation6 + $0xf0] sm:$0xff] %vm240_vm3, %v1485_v41  ;;  %v1486_v32 = vadd.f32 %v3225_v10, %v1450_v5  ;;  %v1668_v58 = vld [vmem:[#allocation6] sm:$0xff]  ;;  %v3274_v10 = vmul.f32 %v1693_v13, %v2990_v57  ;;  %v1257_v50 = vmul.f32 %v2283_v33, %v1232_v27  ;;  %v3302_v27 = vsel %vm240_vm3, %v3245_v23, 0.0 }
 0x3f0   :  { %v1184_v46 = vmul.f32 %v2279_v22, %v1163_v62  ;;  %v1700_v19 = vmul.f32 %v1668_v58, %v3003_v8  ;;  %1118 = vst.msk [vmem:[#allocation6 + $0x20] sm:$0xff] %vm240_vm3, %v1113_v31  ;;  %v1151_v7 = vmul.f32 %v2600_v16, %v1113_v31  ;;  %1119 = vst.msk [vmem:[#allocation6 + $0x28] sm:$0xff] %vm240_vm3, %v1114_v14  ;;  %v1816_v8 = vrot.slane %v3228_v37, 4  ;;  %v2608_v26 = vpop.eup %2607  ;;  %v2291_v58 = vld [vmem:[#allocation4 + $0x6] ss:$0 sm:$0xff] }
 0x3f1   :  { %v1152_v55 = vmul.f32 %v2602_v51, %v1114_v14  ;;  %1491 = vst.msk [vmem:[#allocation6 + $0xf8] sm:$0xff] %vm240_vm3, %v1486_v32  ;;  %v2610_v6 = vpop.eup %2609  ;;  %v3306_v62 = vsel %vm240_vm3, %v3255_v9, 0.0 }
 0x3f2   :  { %v1732_v30 = vsel %vm240_vm3, %v1700_v19, 0.0  ;;  %v1187_v29 = vadd.f32 %v1183_v56, %v1151_v7  ;;  %v1306_v53 = vpop.permute.xlu1 %1305  ;;  %v1817_v45 = vadd.f32 %v1816_v8, %v3228_v37  ;;  %v2612_v13 = vpop.eup %2611 }
 0x3f3   :  { %v1188_v38 = vadd.f32 %v1184_v46, %v1152_v55  ;;  %v1237_v25 = vpop.permute.xlu0 %1236  ;;  %v1734_v3 = vadd.f32 %v1733_v20, %v1732_v30  ;;  %v1670_v43 = vld [vmem:[#allocation6 + $0x10] sm:$0xff]  ;;  %v1671_v57 = vld [vmem:[#allocation6 + $0x18] sm:$0xff]  ;;  %v1331_v5 = vmul.f32 %v2287_v60, %v1306_v53 }
 0x3f4   :  { %v1258_v28 = vmul.f32 %v2283_v33, %v1237_v25  ;;  %v1702_v63 = vmul.f32 %v1670_v43, %v2992_v59  ;;  %v1703_v11 = vmul.f32 %v1671_v57, %v2994_v61  ;;  %1192 = vst.msk [vmem:[#allocation6 + $0x30] sm:$0xff] %vm240_vm3, %v1187_v29  ;;  %v1225_v44 = vmul.f32 %v2604_v42, %v1187_v29  ;;  %v2614_v51 = vpop.eup %2613  ;;  %v2295_v53 = vld [vmem:[#allocation4 + $0x7] ss:$0 sm:$0xff] }
 0x3f5   :  { %1193 = vst.msk [vmem:[#allocation6 + $0x38] sm:$0xff] %vm240_vm3, %v1188_v38  ;;  %v1226_v39 = vmul.f32 %v2606_v52, %v1188_v38  ;;  %v1735_v36 = vrot.slane %v1734_v3, 4  ;;  %v1818_v14 = vrot.slane %v1817_v45, 2  ;;  %v2616_v42 = vpop.eup %2615  ;;  %v1825_v43 = vrot.slane %v3292_v34, 4 }
 0x3f6   :  { %v1741_v59 = vsel %vm240_vm3, %v1702_v63, 0.0  ;;  %v1742_v61 = vsel %vm240_vm3, %v1703_v11, 0.0  ;;  %v1261_v40 = vadd.f32 %v1257_v50, %v1225_v44  ;;  %v1380_v54 = vpop.permute.xlu1 %1379  ;;  %v2618_v38 = vpop.eup %2617  ;;  %v1695_v63 = vld [vmem:[#allocation6 + $0xd8] sm:$0xff] }
 0x3f7   :  { %v1262_v16 = vadd.f32 %v1258_v28, %v1226_v39  ;;  %v1311_v18 = vpop.permute.xlu0 %1310  ;;  %v1672_v47 = vld [vmem:[#allocation6 + $0x20] sm:$0xff]  ;;  %v1743_v41 = vadd.f32 %v1742_v61, %v1741_v59  ;;  %v1673_v1 = vld [vmem:[#allocation6 + $0x28] sm:$0xff]  ;;  %v1736_v37 = vadd.f32 %v1735_v36, %v1734_v3  ;;  %v1405_v55 = vmul.f32 %v2291_v58, %v1380_v54 }
 0x3f8   :  { %v1332_v48 = vmul.f32 %v2287_v60, %v1311_v18  ;;  %v1704_v35 = vmul.f32 %v1672_v47, %v2996_v0  ;;  %v1705_v15 = vmul.f32 %v1673_v1, %v2998_v4  ;;  %1266 = vst.msk [vmem:[#allocation6 + $0x40] sm:$0xff] %vm240_vm3, %v1261_v40  ;;  %v1299_v12 = vmul.f32 %v2608_v26, %v1261_v40  ;;  %v1694_v26 = vld [vmem:[#allocation6 + $0xd0] sm:$0xff]  ;;  %v3508_v54 = vld [vmem:[#allocation13_spill] sm:$0xff] }
 0x3f9   :  { %1267 = vst.msk [vmem:[#allocation6 + $0x48] sm:$0xff] %vm240_vm3, %v1262_v16  ;;  %v1300_v31 = vmul.f32 %v2610_v6, %v1262_v16  ;;  %v1744_v22 = vrot.slane %v1743_v41, 4  ;;  %v1737_v8 = vrot.slane %v1736_v37, 2  ;;  %v1811_v3 = vrot.slane %v3287_v49, 1  ;;  %v3507_v60 = vld [vmem:[#allocation10_spill] sm:$0xff] }
 0x3fa   :  { %v1750_v0 = vsel %vm240_vm3, %v1704_v35, 0.0  ;;  %v1751_v4 = vsel %vm240_vm3, %v1705_v15, 0.0  ;;  %v1335_v32 = vadd.f32 %v1331_v5, %v1299_v12  ;;  %v1454_v46 = vpop.permute.xlu1 %1453  ;;  %v3316_v11 = vadd.f32 %v1818_v14, %v1817_v45 }
 0x3fb   :  { %v1336_v56 = vadd.f32 %v1332_v48, %v1300_v31  ;;  %v1385_v2 = vpop.permute.xlu0 %1384  ;;  %v1674_v19 = vld [vmem:[#allocation6 + $0x30] sm:$0xff]  ;;  %v1745_v20 = vadd.f32 %v1744_v22, %v1743_v41  ;;  %v1752_v52 = vadd.f32 %v1751_v4, %v1750_v0  ;;  %v1479_v50 = vmul.f32 %v2295_v53, %v1454_v46  ;;  %v3510_v46 = vld [vmem:[#allocation17_spill] sm:$0xff] }
 0x3fc   :  { %v1675_v7 = vld [vmem:[#allocation6 + $0x38] sm:$0xff]  ;;  %v1406_v23 = vmul.f32 %v2291_v58, %v1385_v2  ;;  %v1706_v9 = vmul.f32 %v1674_v19, %v3013_v21  ;;  %1340 = vst.msk [vmem:[#allocation6 + $0x50] sm:$0xff] %vm240_vm3, %v1335_v32  ;;  %v1373_v29 = vmul.f32 %v2612_v13, %v1335_v32  ;;  %v1738_v47 = vadd.f32 %v1737_v8, %v1736_v37 }
 0x3fd   :  { %v1707_v30 = vmul.f32 %v1675_v7, %v3019_v24  ;;  %1341 = vst.msk [vmem:[#allocation6 + $0x58] sm:$0xff] %vm240_vm3, %v1336_v56  ;;  %v1374_v33 = vmul.f32 %v2616_v42, %v1336_v56  ;;  %v1746_v25 = vrot.slane %v1745_v20, 2  ;;  %v1753_v5 = vrot.slane %v1752_v52, 4  ;;  %v3509_v58 = vld [vmem:[#allocation15_spill] sm:$0xff] }
 0x3fe   :  { %v1409_v57 = vadd.f32 %v1405_v55, %v1373_v29  ;;  %v1641_v21 = vpop.permute.xlu1 %1640  ;;  %v1759_v61 = vsel %vm240_vm3, %v1706_v9, 0.0  ;;  %v1739_v7 = vrot.slane %v1738_v47, 1  ;;  %v1696_v9 = vld [vmem:[#allocation6 + $0xe0] sm:$0xff] }
 0x3ff   :  { %v1410_v28 = vadd.f32 %v1406_v23, %v1374_v33  ;;  %v1645_v24 = vpop.permute.xlu0 %1644  ;;  %v1676_v44 = vld [vmem:[#allocation6 + $0x40] sm:$0xff]  ;;  %v1726_v36 = vmul.f32 %v1694_v26, %v1641_v21  ;;  %v1760_v40 = vsel %vm240_vm3, %v1707_v30, 0.0  ;;  %v1747_v1 = vadd.f32 %v1746_v25, %v1745_v20 }
 0x400   :  { %v1677_v39 = vld [vmem:[#allocation6 + $0x48] sm:$0xff]  ;;  %v1727_v59 = vmul.f32 %v1695_v63, %v1645_v24  ;;  %v1708_v16 = vmul.f32 %v1676_v44, %v3507_v60  ;;  %1414 = vst.msk [vmem:[#allocation6 + $0x60] sm:$0xff] %vm240_vm3, %v1409_v57  ;;  %v1447_v6 = vmul.f32 %v2614_v51, %v1409_v57  ;;  %v1761_v12 = vadd.f32 %v1760_v40, %v1759_v61 }
 0x401   :  { %v1709_v18 = vmul.f32 %v1677_v39, %v3508_v54  ;;  %1415 = vst.msk [vmem:[#allocation6 + $0x68] sm:$0xff] %vm240_vm3, %v1410_v28  ;;  %v1849_v45 = vsel %vm240_vm3, %v1726_v36, 0.0  ;;  %v1448_v0 = vmul.f32 %v2618_v38, %v1410_v28  ;;  %v1754_v4 = vadd.f32 %v1753_v5, %v1752_v52 }
 0x402   :  { %v1850_v41 = vsel %vm240_vm3, %v1727_v59, 0.0  ;;  %v1483_v48 = vadd.f32 %v1479_v50, %v1447_v6  ;;  %v1564_v35 = vpop.permute.xlu1 %1563  ;;  %v1768_v31 = vsel %vm240_vm3, %v1708_v16, 0.0  ;;  %v1762_v42 = vrot.slane %v1761_v12, 4 }
 0x403   :  { %v1851_v13 = vadd.f32 %v1850_v41, %v1849_v45  ;;  %v1459_v15 = vpop.permute.xlu0 %1458  ;;  %v1678_v22 = vld [vmem:[#allocation6 + $0x50] sm:$0xff]  ;;  %v1769_v37 = vsel %vm240_vm3, %v1709_v18, 0.0  ;;  %v1755_v55 = vrot.slane %v1754_v4, 2  ;;  %v1748_v57 = vrot.slane %v1747_v1, 1  ;;  %v1697_v18 = vld [vmem:[#allocation6 + $0xe8] sm:$0xff] }
 0x404   :  { %v1679_v14 = vld [vmem:[#allocation6 + $0x58] sm:$0xff]  ;;  %v1480_v51 = vmul.f32 %v2295_v53, %v1459_v15  ;;  %1488 = vst.msk [vmem:[#allocation6 + $0x70] sm:$0xff] %vm240_vm3, %v1483_v48  ;;  %v1710_v56 = vmul.f32 %v1678_v22, %v3509_v58  ;;  %v1770_v23 = vadd.f32 %v1769_v37, %v1768_v31  ;;  %v1763_v29 = vadd.f32 %v1762_v42, %v1761_v12  ;;  %v1698_v58 = vld [vmem:[#allocation6 + $0xf0] sm:$0xff] }
 0x405   :  { %v1852_v32 = vrot.slane %v1851_v13, 4  ;;  %v1711_v2 = vmul.f32 %v1679_v14, %v3510_v46  ;;  %v1756_v63 = vadd.f32 %v1755_v55, %v1754_v4  ;;  %v3337_v36 = vadd.f32 %v1811_v3, %v3287_v49 }
 0x406   :  { %v1484_v19 = vadd.f32 %v1480_v51, %v1448_v0  ;;  %v1652_v20 = vpop.permute.xlu1 %1651  ;;  %v1777_v33 = vsel %vm240_vm3, %v1710_v56, 0.0  ;;  %v1771_v50 = vrot.slane %v1770_v23, 4  ;;  %v1764_v44 = vrot.slane %v1763_v29, 2 }
 0x407   :  { %v1853_v8 = vadd.f32 %v1852_v32, %v1851_v13  ;;  %v1568_v30 = vpop.permute.xlu0 %1567  ;;  %v1778_v38 = vsel %vm240_vm3, %v1711_v2, 0.0  ;;  %v1680_v53 = vld [vmem:[#allocation6 + $0x60] sm:$0xff]  ;;  %v1728_v25 = vmul.f32 %v1696_v9, %v1652_v20  ;;  %v1826_v59 = vadd.f32 %v1825_v43, %v3292_v34 }
 0x408   :  { %1489 = vst.msk [vmem:[#allocation6 + $0x78] sm:$0xff] %vm240_vm3, %v1484_v19  ;;  %v1681_v52 = vld [vmem:[#allocation6 + $0x68] sm:$0xff]  ;;  %v1779_v28 = vadd.f32 %v1778_v38, %v1777_v33  ;;  %v1712_v26 = vmul.f32 %v1680_v53, %v1564_v35  ;;  %v1772_v6 = vadd.f32 %v1771_v50, %v1770_v23  ;;  %v3344_v48 = vadd.f32 %v1739_v7, %v1738_v47  ;;  %v3511_v2 = vld [vmem:[#allocation16_spill] sm:$0xff]  ;;  %v1699_v53 = vld [vmem:[#allocation6 + $0xf8] sm:$0xff] }
 0x409   :  { %v1854_v21 = vrot.slane %v1853_v8, 2  ;;  %v1713_v24 = vmul.f32 %v1681_v52, %v1568_v30  ;;  %v1820_v49 = vrot.slane %v3316_v11, 1  ;;  %v1858_v13 = vsel %vm240_vm3, %v1728_v25, 0.0 }
 0x40a   :  { %v1780_v39 = vrot.slane %v1779_v28, 4  ;;  %v1786_v40 = vsel %vm240_vm3, %v1712_v26, 0.0  ;;  %v1575_v16 = vpop.permute.xlu1 %1574  ;;  %v3348_v34 = vadd.f32 %v1748_v57, %v1747_v1  ;;  %v1757_v43 = vrot.slane %v1756_v63, 1 }
 0x40b   :  { %v1855_v61 = vadd.f32 %v1854_v21, %v1853_v8  ;;  %v1787_v60 = vsel %vm240_vm3, %v1713_v24, 0.0  ;;  %v1656_v54 = vpop.permute.xlu0 %1655  ;;  %v1682_v41 = vld [vmem:[#allocation6 + $0x70] sm:$0xff]  ;;  %v1765_v47 = vadd.f32 %v1764_v44, %v1763_v29  ;;  %v1773_v37 = vrot.slane %v1772_v6, 2  ;;  %v3513_v21 = vld [vmem:[#allocation12_spill] sm:$0xff] }
 0x40c   :  { %v1788_v45 = vadd.f32 %v1787_v60, %v1786_v40  ;;  %v1729_v5 = vmul.f32 %v1697_v18, %v1656_v54  ;;  %v1714_v15 = vmul.f32 %v1682_v41, %v1575_v16  ;;  %v1781_v31 = vadd.f32 %v1780_v39, %v1779_v28 }
 0x40d   :  { %v1856_v3 = vrot.slane %v1855_v61, 1  ;;  %v3352_v46 = vadd.f32 %v1820_v49, %v3316_v11  ;;  %v1827_v1 = vrot.slane %v1826_v59, 2  ;;  %v3512_v42 = vrot.slane %v3511_v2, 5 }
 0x40e   :  { %v1789_v35 = vrot.slane %v1788_v45, 4  ;;  %v1859_v12 = vsel %vm240_vm3, %v1729_v5, 0.0  ;;  %v1663_v0 = vpop.permute.xlu1 %1662  ;;  %v1758_v23 = vadd.f32 %v1757_v43, %v1756_v63  ;;  %v1795_v20 = vsel %vm240_vm3, %v1714_v15, 0.0  ;;  %v3515_v43 = vld [vmem:[#allocation14_spill] sm:$0xff] }
 0x40f   :  { %v1857_v22 = vadd.f32 %v1856_v3, %v1855_v61  ;;  %v1860_v14 = vadd.f32 %v1859_v12, %v1858_v13  ;;  %v1579_v51 = vpop.permute.xlu0 %1578  ;;  %v1683_v4 = vld [vmem:[#allocation6 + $0x78] sm:$0xff]  ;;  %v1730_v55 = vmul.f32 %v1698_v58, %v1663_v0  ;;  %v1782_v30 = vrot.slane %v1781_v31, 2 }
 0x410   :  { %v1790_v32 = vadd.f32 %v1789_v35, %v1788_v45  ;;  %v1715_v56 = vmul.f32 %v1683_v4, %v1579_v51  ;;  %v1766_v25 = vrot.slane %v1765_v47, 1  ;;  %v1774_v11 = vadd.f32 %v1773_v37, %v1772_v6  ;;  %v3517_v37 = vld [vmem:[#allocation11_spill] sm:$0xff] }
 0x411   :  { %v1930_v19 = vadd.f32 %v3512_v42, %v1857_v22  ;;  %v1861_v7 = vrot.slane %v1860_v14, 4  ;;  %v1828_v50 = vadd.f32 %v1827_v1, %v1826_v59  ;;  %v1833_v28 = vadd.f32 %v3306_v62, %v3302_v27 }
 0x412   :  { %v1791_v8 = vrot.slane %v1790_v32, 2  ;;  %v1796_v9 = vsel %vm240_vm3, %v1715_v56, 0.0  ;;  %v3514_v26 = vrot.slane %v3513_v21, 5  ;;  %v1867_v44 = vsel %vm240_vm3, %v1730_v55, 0.0 }
 0x413   :  { %v1862_v29 = vadd.f32 %v1861_v7, %v1860_v14  ;;  %v1797_v33 = vadd.f32 %v1796_v9, %v1795_v20  ;;  %v1667_v38 = vpop.permute.xlu0 %1666  ;;  %v1783_v60 = vadd.f32 %v1782_v30, %v1781_v31  ;;  %v1834_v16 = vrot.slane %v1833_v28, 4 }
 0x414   :  { %v1792_v52 = vadd.f32 %v1791_v8, %v1790_v32  ;;  %v1731_v57 = vmul.f32 %v1699_v53, %v1667_v38  ;;  %v1992_v24 = vmul.f32 %v3514_v26, %v1930_v19  ;;  %v1775_v45 = vrot.slane %v1774_v11, 1 }
 0x415   :  { %v1863_v63 = vrot.slane %v1862_v29, 2  ;;  %v1798_v39 = vrot.slane %v1797_v33, 4  ;;  %v1829_v41 = vrot.slane %v1828_v50, 1  ;;  %v1835_v5 = vadd.f32 %v1834_v16, %v1833_v28 }
 0x416   :  { %v1793_v61 = vrot.slane %v1792_v52, 1  ;;  %v1868_v40 = vsel %vm240_vm3, %v1731_v57, 0.0  ;;  %v1840_v27 = vsel %vm240_vm3, %v3271_v17, 0.0  ;;  %v2008_v62 = vpack.c.bf16 %v1992_v24, %v1992_v24 }
 0x417   :  { %v1864_v54 = vadd.f32 %v1863_v63, %v1862_v29  ;;  %v1799_v18 = vadd.f32 %v1798_v39, %v1797_v33  ;;  %v1869_v6 = vadd.f32 %v1868_v40, %v1867_v44  ;;  %v3516_v35 = vrot.slane %v3515_v43, 6 }
 0x418   :  { %v1794_v59 = vadd.f32 %v1793_v61, %v1792_v52  ;;  %v1784_v12 = vrot.slane %v1783_v60, 1  ;;  %v1836_v31 = vrot.slane %v1835_v5, 2  ;;  %v1841_v22 = vsel %vm240_vm3, %v3274_v10, 0.0 }
 0x419   :  { %v1865_v49 = vrot.slane %v1864_v54, 1  ;;  %v1800_v3 = vrot.slane %v1799_v18, 2  ;;  %v1870_v13 = vrot.slane %v1869_v6, 4  ;;  %v1842_v4 = vadd.f32 %v1841_v22, %v1840_v27 }
 0x41a   :  { %v1923_v15 = vadd.f32 %v3516_v35, %v1794_v59  ;;  %v3518_v32 = vrot.slane %v3517_v37, 6  ;;  %v1767_v17 = vadd.f32 %v1766_v25, %v1765_v47  ;;  %v1776_v56 = vadd.f32 %v1775_v45, %v1774_v11 }
 0x41b   :  { %v1866_v14 = vadd.f32 %v1865_v49, %v1864_v54  ;;  %v1801_v0 = vadd.f32 %v1800_v3, %v1799_v18  ;;  %v1871_v51 = vadd.f32 %v1870_v13, %v1869_v6  ;;  %v1837_v1 = vadd.f32 %v1836_v31, %v1835_v5 }
 0x41c   :  { %v1985_v58 = vmul.f32 %v3518_v32, %v1923_v15  ;;  %v1830_v7 = vadd.f32 %v1829_v41, %v1828_v50  ;;  %v1843_v55 = vrot.slane %v1842_v4, 4  ;;  %v3372_v8 = vunpack.c.l.b16 %v2008_v62 }
 0x41d   :  { %v1802_v42 = vrot.slane %v1801_v0, 1  ;;  %v1872_v19 = vrot.slane %v1871_v51, 2  ;;  %v3519_v20 = vrot.slane %v3511_v2, 6  ;;  %v1785_v10 = vadd.f32 %v1784_v12, %v1783_v60 }
 0x41e   :  { %v1838_v30 = vrot.slane %v1837_v1, 1  ;;  %v2001_v29 = vpack.c.bf16 %v1985_v58, %v1985_v58  ;;  %v1844_v53 = vadd.f32 %v1843_v55, %v1842_v4  ;;  %v1917_v47 = vadd.f32 %v3515_v43, %v3344_v48 }
 0x41f   :  { %v1931_v9 = vadd.f32 %v3519_v20, %v1866_v14  ;;  %v1803_v33 = vadd.f32 %v1802_v42, %v1801_v0  ;;  %v1873_v38 = vadd.f32 %v1872_v19, %v1871_v51  ;;  %v3520_v25 = vrot.slane %v3515_v43, 1 }
 0x420   :  { %v1839_v52 = vadd.f32 %v1838_v30, %v1837_v1  ;;  %v3521_v57 = vrot.slane %v3515_v43, 2  ;;  %v3522_v28 = vrot.slane %v3515_v43, 7  ;;  %v1845_v63 = vrot.slane %v1844_v53, 2 }
 0x421   :  { %v1918_v11 = vadd.f32 %v3520_v25, %v3348_v34  ;;  %v1874_v24 = vrot.slane %v1873_v38, 1  ;;  %v3523_v44 = vrot.slane %v3515_v43, 3  ;;  %v3524_v61 = vrot.slane %v3513_v21, 6 }
 0x422   :  { %v1919_v50 = vadd.f32 %v3521_v57, %v1758_v23  ;;  %v1924_v26 = vadd.f32 %v3522_v28, %v1803_v33  ;;  %v3525_v48 = vrot.slane %v3515_v43, 4  ;;  %v3526_v16 = vrot.slane %v3515_v43, 5 }
 0x423   :  { %v1920_v39 = vadd.f32 %v3523_v44, %v1767_v17  ;;  %v1993_v40 = vmul.f32 %v3524_v61, %v1931_v9  ;;  %v3527_v23 = vrot.slane %v3511_v2, 1  ;;  %v3396_v18 = vunpack.c.l.b16 %v2001_v29 }
 0x424   :  { %v1921_v60 = vadd.f32 %v3525_v48, %v1776_v56  ;;  %v1922_v34 = vadd.f32 %v3526_v16, %v1785_v10  ;;  %v1875_v6 = vadd.f32 %v1874_v24, %v1873_v38  ;;  %v1846_v45 = vadd.f32 %v1845_v63, %v1844_v53 }
 0x425   :  { %v1926_v54 = vadd.f32 %v3527_v23, %v3352_v46  ;;  %v3528_v59 = vrot.slane %v3511_v2, 2  ;;  %v1925_v5 = vadd.f32 %v3511_v2, %v3337_v36  ;;  %v3529_v27 = vrot.slane %v3511_v2, 3 }
 0x426   :  { %v3530_v49 = vrot.slane %v3517_v37, 1  ;;  %v3531_v13 = vrot.slane %v3517_v37, 2  ;;  %v3532_v46 = vrot.slane %v3517_v37, 7  ;;  %v3533_v15 = vrot.slane %v3511_v2, 7 }
 0x427   :  { %v1927_v41 = vadd.f32 %v3528_v59, %v1830_v7  ;;  %v1928_v62 = vadd.f32 %v3529_v27, %v1839_v52  ;;  %v1847_v31 = vrot.slane %v1846_v45, 1  ;;  %v3534_v22 = vrot.slane %v3517_v37, 3 }
 0x428   :  { %v1980_v3 = vmul.f32 %v3530_v49, %v1918_v11  ;;  %v1981_v43 = vmul.f32 %v3531_v13, %v1919_v50  ;;  %v1986_v35 = vmul.f32 %v3532_v46, %v1924_v26  ;;  %v1932_v12 = vadd.f32 %v3533_v15, %v1875_v6 }
 0x429   :  { %v1982_v14 = vmul.f32 %v3534_v22, %v1920_v39  ;;  %v2009_v36 = vpack.c.bf16 %v1993_v40, %v1993_v40  ;;  %v3535_v0 = vrot.slane %v3517_v37, 4  ;;  %v3536_v4 = vrot.slane %v3517_v37, 5 }
 0x42a   :  { %v3537_v58 = vrot.slane %v3513_v21, 1  ;;  %v3538_v56 = vrot.slane %v3513_v21, 7  ;;  %v1848_v42 = vadd.f32 %v1847_v31, %v1846_v45  ;;  %v1979_v19 = vmul.f32 %v3517_v37, %v1917_v47 }
 0x42b   :  { %v1983_v51 = vmul.f32 %v3535_v0, %v1921_v60  ;;  %v1984_v32 = vmul.f32 %v3536_v4, %v1922_v34  ;;  %v3539_v7 = vrot.slane %v3513_v21, 2  ;;  %v1987_v20 = vmul.f32 %v3513_v21, %v1925_v5 }
 0x42c   :  { %v1988_v17 = vmul.f32 %v3537_v58, %v1926_v54  ;;  %v1994_v1 = vmul.f32 %v3538_v56, %v1932_v12  ;;  %v3540_v9 = vrot.slane %v3513_v21, 3  ;;  %v1996_v30 = vpack.c.bf16 %v1980_v3, %v1980_v3 }
 0x42d   :  { %v1989_v55 = vmul.f32 %v3539_v7, %v1927_v41  ;;  %v1997_v29 = vpack.c.bf16 %v1981_v43, %v1981_v43  ;;  %v2002_v33 = vpack.c.bf16 %v1986_v35, %v1986_v35  ;;  %v3541_v53 = vrot.slane %v3511_v2, 4 }
 0x42e   :  { %v1990_v10 = vmul.f32 %v3540_v9, %v1928_v62  ;;  %v2010_v38 = vpack.c.bf16 %v1994_v1, %v1994_v1  ;;  %v1998_v25 = vpack.c.bf16 %v1982_v14, %v1982_v14  ;;  %v2049_v37 = vunpack.c.l.b16 %v2009_v36 }
 0x42f   :  { %v1929_v52 = vadd.f32 %v3541_v53, %v1848_v42  ;;  %v1999_v47 = vpack.c.bf16 %v1983_v51, %v1983_v51  ;;  %v2000_v11 = vpack.c.bf16 %v1984_v32, %v1984_v32  ;;  %v2004_v57 = vpack.c.bf16 %v1988_v17, %v1988_v17 }
 0x430   :  { %v3542_v50 = vrot.slane %v3513_v21, 4  ;;  %v1995_v26 = vpack.c.bf16 %v1979_v19, %v1979_v19  ;;  %v2005_v24 = vpack.c.bf16 %v1989_v55, %v1989_v55  ;;  %v2006_v63 = vpack.c.bf16 %v1990_v10, %v1990_v10  ;;  %v2526_v55 = vld [vmem:[%s3483_s15 + $0x8] sm:$0xff]   ;;  %s2619_s15 = scalar_lea.vmem %s2231_s23, 256 }
 0x431   :  { %v2003_v44 = vpack.c.bf16 %v1987_v20, %v1987_v20  ;;  %v2036_v39 = vunpack.c.l.b16 %v1996_v30  ;;  %v2037_v61 = vunpack.c.l.b16 %v1997_v29  ;;  %v2038_v40 = vunpack.c.l.b16 %v1998_v25  ;;  %2455 = vmatpush3.bf16.msra.mxu1 %v2526_v55  ;;  %p2620_p0 = scmp.ne.s32.totalorder %s2231_s23, %s2619_s15  ;;  %p2625_p2 = scmp.lt.s32.totalorder %s2619_s15, %s2619_s15 }
 0x432   :  { %v1991_v28 = vmul.f32 %v3542_v50, %v1929_v52  ;;  %v2042_v2 = vunpack.c.l.b16 %v2002_v33  ;;  %v2050_v48 = vunpack.c.l.b16 %v2010_v38  ;;  %v2039_v16 = vunpack.c.l.b16 %v1999_v47  ;;  %v2303_v33 = vld [vmem:[%s3484_s16] ss:$0 sm:$0xff] }
 0x433   :  { %v2040_v34 = vunpack.c.l.b16 %v2000_v11  ;;  %v2044_v23 = vunpack.c.l.b16 %v2004_v57  ;;  %v2045_v54 = vunpack.c.l.b16 %v2005_v24  ;;  %v2046_v6 = vunpack.c.l.b16 %v2006_v63  ;;  %p2626_p3 = por %p2625_p2, %p2624_p1 }
 0x434   :  { %v2007_v60 = vpack.c.bf16 %v1991_v28, %v1991_v28  ;;  %v2035_v45 = vunpack.c.l.b16 %v1995_v26  ;;  %v2051_v21 = vrot.slane %v2036_v39, 7  ;;  %v2054_v41 = vrot.slane %v2037_v61, 6 }
 0x435   :  { %v2043_v5 = vunpack.c.l.b16 %v2003_v44  ;;  %v2057_v27 = vrot.slane %v2038_v40, 5  ;;  %v2072_v62 = vrot.slane %v2044_v23, 7  ;;  %v2074_v49 = vrot.slane %v2045_v54, 6  ;;  %p2627_p4 = pnand %p2626_p3, %p2620_p0 }
 0x436   :  { %v2047_v59 = vunpack.c.l.b16 %v2007_v60  ;;  %v2060_v3 = vrot.slane %v2039_v16, 4  ;;  %v2076_v13 = vrot.slane %v2046_v6, 5  ;;  %v2080_v46 = vrot.slane %v3372_v8, 3 }
 0x437   :  { %v2053_v35 = vsel %vm2052_vm10, %v2051_v21, %v2035_v45  ;;  %v2063_v15 = vrot.slane %v2040_v34, 3  ;;  %v2073_v12 = vsel %vm2052_vm10, %v2072_v62, %v2043_v5  ;;  %v2066_v31 = vrot.slane %v3396_v18, 2 }
 0x438   :  { %v2078_v43 = vrot.slane %v2047_v59, 4  ;;  %v2082_v22 = vrot.slane %v2049_v37, 2  ;;  %v2056_v14 = vsel %vm2055_vm11, %v2054_v41, %v2053_v35  ;;  %v2075_v36 = vsel %vm2055_vm11, %v2074_v49, %v2073_v12 }
 0x439   :  { %v2069_v0 = vrot.slane %v2042_v2, 1  ;;  %v2084_v51 = vrot.slane %v2050_v48, 1  ;;  %v2059_v4 = vsel %vm2058_vm12, %v2057_v27, %v2056_v14  ;;  %v2077_v32 = vsel %vm2058_vm12, %v2076_v13, %v2075_v36 }
 0x43a   :  { %v2062_v8 = vsel %vm2061_vm13, %v2060_v3, %v2059_v4  ;;  %v2079_v58 = vsel %vm2061_vm13, %v2078_v43, %v2077_v32 }
 0x43b   :  { %v2065_v17 = vsel %vm2064_vm14, %v2063_v15, %v2062_v8  ;;  %v2081_v18 = vsel %vm2064_vm14, %v2080_v46, %v2079_v58 }
 0x43c   :  { %v2068_v56 = vsel %vm2067_vm15, %v2066_v31, %v2065_v17  ;;  %v2083_v1 = vsel %vm2067_vm15, %v2082_v22, %v2081_v18 }
 0x43d   :  { %v2071_v42 = vsel %vm2070_vm1, %v2069_v0, %v2068_v56  ;;  %v2085_v19 = vsel %vm2070_vm1, %v2084_v51, %v2083_v1 }
 0x43e   :  { %v2086_v7 = vpack.c.b16 %v2085_v19, %v2071_v42 }
 0x440   :  { %2449 = vmatmul.mubr.msk.bf16.vlgmr.msra.gmra.mrb[12].mxu0 %vm240_vm3, %v2086_v7 }
 0x513   :  { %v2148_v20 = vpop.f32.mrb[12].mxu0 }
 0x514   :  { %v2450_v9 = vpop.f32.mrb[13].mxu0 }
 0x515   :  { %v2151_v10 = vpop.f32.mrb[14].mxu0 }
 0x516   :  { %v2155_v30 = vpack.c.bf16 %v2151_v10, %v2148_v20  ;;  %v2451_v29 = vpop.f32.mrb[15].mxu0 }
 0x518   :  { %2457 = vmatmul.mubr.msk.bf16.vlgmr.msra.gmra.mrb[8].mxu1 %vm138_vm2, %v2155_v30 }
 0x5eb   :  { %v2216_v38 = vpop.f32.mrb[8].mxu1 }
 0x5ec   :  { %v2217_v53 = vadd.f32 %v2303_v33, %v2216_v38  ;;  %v2458_v52 = vpop.f32.mrb[9].mxu1 }
 0x5ed   :  { %v2219_v25 = vpop.f32.mrb[10].mxu1 }
 0x5ee   :  { %2223 = vst.msk [vmem:[#allocation7] sm:$0xff] %vm76_vm0, %v2217_v53  ;;  %v2220_v37 = vadd.f32 %v2303_v33, %v2219_v25  ;;  %v2459_v47 = vpop.f32.mrb[11].mxu1 }
 0x5f0   :  { %2224 = vst.msk [vmem:[#allocation7 + $0x8] sm:$0xff] %vm76_vm0, %v2220_v37 }
 0x5f1   :  { %2630 = shalt.err (!%p2627_p4)
}
 0x5f2   :  { %s2631_s25 = scalar_lea.hbm %s3485_s17, 256 }
 0x5f3   :  { %p2632_p5 = scmp.ne.s32.totalorder %s3485_s17, %s2631_s25  ;;  %p2635_p6 = scmp.lt.u32.totalorder %s2631_s25, %s3485_s17 }
 0x5f5   :  { %p2637_p7 = pnand %p2635_p6, %p2632_p5 }
 0x5f7   :  { %2640 = shalt.err (!%p2637_p7)
}
 0x5f8   :  { %s2647_s11 = smov 128   ;;  %s2648_s2 = smov 8  }
 0x5f9   :  { %2236 = dma.vmem_to_hbm [thread:$0]  %s2231_s23, 256, %s3485_s17, [#allocation8], %s2647_s11, %s2647_s11, %s2648_s2  }
 0x5fa   :  { %2641 = dma.done.wait [#allocation8], 256  }
 0x5fb   :  { %2642 = vsyncadd [#allocation8], 4294967040 }
 0x5fc   :  { %2240 = vsyncpa [#allocation8], 1 }

</bundles_post_ra>
